<compile_context>
chip_gen: v5e
topology: v5e:2x2
jax: 0.10.0
libtpu: 0.0.40
codegen_flags: <defaults>
</compile_context>

<pallas_src>
import functools

import jax
import jax.numpy as jnp
from jax.experimental import pallas as pl
from jax.experimental.pallas import tpu as pltpu

EPS = 1e-5
LANE = 128


def _round_up(x, m):
    return (x + m - 1) // m * m


def actor_kernel(x_ref, w1_ref, w2_hbm, w3_hbm, vec_ref, out_ref,
                 w2_vmem, w3_vmem, dma_sem, *, S, H1, H2, A):
    """Single-block forward (H1/H2/A are the lane-padded sizes).

    x_ref   : (B, S)    f32   VMEM
    w1_ref  : (S, H1)   bf16  VMEM (auto-DMA'd before the body)
    w2_hbm  : (H1, H2)  bf16  HBM  (manual DMA, overlapped with layer 1)
    w3_hbm  : (H2, A)   bf16  HBM  (manual DMA, overlapped with layers 1-2)
    vec_ref : (9, W)    f32   packed per-feature slab, zero-padded rows:
              0: bn1_gamma[:S]   1: bn1_beta[:S]
              2: fc1_bias[:H1]   3: bn2_gamma[:H1]  4: bn2_beta[:H1]
              5: fc2_bias[:H2]   6: bn3_gamma[:H2]  7: bn3_beta[:H2]
              8: fc3_bias[:A]
    out_ref : (B, A)    f32   VMEM (lane-dense; wrapper slices to real A)
    """
    # Kick off the later-layer weight DMAs immediately so they overlap with
    # bn1/fc1 (and bn2/fc2) compute.  The BlockSpec'd inputs were already
    # resident in VMEM when the body started.
    cp_w2 = pltpu.make_async_copy(w2_hbm, w2_vmem, dma_sem.at[0])
    cp_w3 = pltpu.make_async_copy(w3_hbm, w3_vmem, dma_sem.at[1])
    cp_w2.start()
    cp_w3.start()

    def batchnorm(x, gamma, beta):
        # Training-mode BatchNorm1d with biased batch statistics.
        # Two-pass variance for robustness; folded into one scale/shift FMA
        # on the (B, N) activation (2 VPU passes instead of 4).
        mu = jnp.mean(x, axis=0, keepdims=True)
        var = jnp.mean(jnp.square(x - mu), axis=0, keepdims=True)
        scale = gamma * jax.lax.rsqrt(var + EPS)       # (1, N) row math
        shift = beta - mu * scale                      # (1, N) row math
        return x * scale + shift                       # (B, N) work

    x = x_ref[...].astype(jnp.float32)

    g1, be1 = vec_ref[0:1, :S], vec_ref[1:2, :S]
    b1, g2, be2 = vec_ref[2:3, :H1], vec_ref[3:4, :H1], vec_ref[4:5, :H1]
    b2, g3, be3 = vec_ref[5:6, :H2], vec_ref[6:7, :H2], vec_ref[7:8, :H2]
    b3 = vec_ref[8:9, :A]

    # bn1 -> fc1 -> relu   (bf16 MXU operands, f32 accumulation)
    x = batchnorm(x, g1, be1)
    h1 = jnp.dot(x.astype(jnp.bfloat16), w1_ref[...],
                 preferred_element_type=jnp.float32) + b1
    h1 = jnp.maximum(h1, 0.0)

    # bn2 -> fc2 -> relu   (wait for w2 only now: DMA hidden behind layer 1)
    h1 = batchnorm(h1, g2, be2)
    cp_w2.wait()
    h2 = jnp.dot(h1.astype(jnp.bfloat16), w2_vmem[...],
                 preferred_element_type=jnp.float32) + b2
    h2 = jnp.maximum(h2, 0.0)

    # bn3 -> fc3 -> tanh   (wait for w3 only now)
    h2 = batchnorm(h2, g3, be3)
    cp_w3.wait()
    out = jnp.dot(h2.astype(jnp.bfloat16), w3_vmem[...],
                  preferred_element_type=jnp.float32) + b3
    out_ref[...] = jnp.tanh(out).astype(out_ref.dtype)


@functools.partial(jax.jit, static_argnames=("action_size",))
def actor_forward(states, params, *, action_size):
    """Grid-less pallas_call; full-batch BN stats computed in one block."""
    B, S = states.shape
    H1p = params["w1"].shape[1]
    H2p = params["w2"].shape[1]
    Ap = params["w3"].shape[1]

    kernel = functools.partial(actor_kernel, S=S, H1=H1p, H2=H2p, A=Ap)
    vmem = pl.BlockSpec(memory_space=pltpu.MemorySpace.VMEM)
    hbm = pl.BlockSpec(memory_space=pl.ANY)

    # VMEM footprint from real byte counts (bf16 weights/scratch, f32 acts).
    w_bytes = 2 * (S * H1p + H1p * H2p + H2p * Ap)
    act_bytes = 4 * B * (S + H1p + H2p + Ap)
    vec_bytes = 4 * params["vec"].size
    need = 4 * (w_bytes + act_bytes + vec_bytes)          # 4x headroom for temps
    compiler_params = None
    if need > 16 * 1024 * 1024:
        # Only override when the default scoped budget (16 MiB on v5e) would
        # not fit (e.g. large-B learner batches); cap at v7x physical 64 MiB.
        compiler_params = pltpu.CompilerParams(
            vmem_limit_bytes=min(_round_up(need, 1 << 20), 64 * 1024 * 1024))

    out_padded = pl.pallas_call(
        kernel,
        out_shape=jax.ShapeDtypeStruct((B, Ap), jnp.float32),
        in_specs=[vmem, vmem, hbm, hbm, vmem],
        out_specs=vmem,
        scratch_shapes=[
            pltpu.VMEM((H1p, H2p), jnp.bfloat16),   # w2 landing buffer
            pltpu.VMEM((H2p, Ap), jnp.bfloat16),    # w3 landing buffer
            pltpu.SemaphoreType.DMA((2,)),
        ],
        compiler_params=compiler_params,
    )(states, params["w1"], params["w2"], params["w3"], params["vec"])
    return out_padded[:, :action_size]


def _pack_vectors(rows, width):
    """Pack 1-D f32 vectors into a (len(rows), width) zero-padded slab."""
    slab = jnp.zeros((len(rows), width), jnp.float32)
    for i, r in enumerate(rows):
        slab = slab.at[i, : r.shape[0]].set(r)
    return slab


def init_actor_params(key, state_size, action_size, hidden_units=(400, 300)):
    """Parameter init mirroring the PyTorch module, with lane padding.

    hidden_init uses weight.size()[0] (== out_features), reproducing the
    original code's fan convention.  Linear biases keep PyTorch's default
    U(-1/sqrt(in_features), 1/sqrt(in_features)).  BatchNorm affine params are
    gamma=1, beta=0.  Hidden and action dims are zero-padded to multiples of
    128; padded features get gamma=0, beta=0, bias=0 and zero weight rows in
    the following layer, which keeps the padded computation exact.
    """
    h1, h2 = hidden_units
    h1p, h2p, ap = _round_up(h1, LANE), _round_up(h2, LANE), _round_up(action_size, LANE)
    keys = jax.random.split(key, 6)

    def uni(k, shape, lim):
        return jax.random.uniform(k, shape, jnp.float32, -lim, lim)

    w1 = uni(keys[0], (state_size, h1), 1.0 / (h1 ** 0.5))   # hidden_init(fc1)
    w2 = uni(keys[1], (h1, h2), 1.0 / (h2 ** 0.5))           # hidden_init(fc2)
    w3 = uni(keys[2], (h2, action_size), 0.003)
    b1 = uni(keys[3], (h1,), 1.0 / (state_size ** 0.5))
    b2 = uni(keys[4], (h2,), 1.0 / (h1 ** 0.5))
    b3 = uni(keys[5], (action_size,), 1.0 / (h2 ** 0.5))

    bn1_g, bn1_b = jnp.ones((state_size,), jnp.float32), jnp.zeros((state_size,), jnp.float32)
    bn2_g, bn2_b = jnp.ones((h1,), jnp.float32), jnp.zeros((h1,), jnp.float32)
    bn3_g, bn3_b = jnp.ones((h2,), jnp.float32), jnp.zeros((h2,), jnp.float32)

    # Lane-padded weights (zero pad columns / rows; exact under gamma=beta=bias=0).
    w1p = jnp.zeros((state_size, h1p), jnp.float32).at[:, :h1].set(w1)
    w2p = jnp.zeros((h1p, h2p), jnp.float32).at[:h1, :h2].set(w2)
    w3p = jnp.zeros((h2p, ap), jnp.float32).at[:h2, :action_size].set(w3)

    width = _round_up(max(state_size, h1p, h2p, ap), LANE)
    vec = _pack_vectors(
        [bn1_g, bn1_b, b1, bn2_g, bn2_b, b2, bn3_g, bn3_b, b3], width
    )

    return {
        # kernel inputs (padded, bf16 weights for the MXU)
        "w1": w1p.astype(jnp.bfloat16),
        "w2": w2p.astype(jnp.bfloat16),
        "w3": w3p.astype(jnp.bfloat16),
        "vec": vec,
        # unpadded copies used only by the pure-JAX reference
        "w1_full": w1.astype(jnp.bfloat16),
        "w2_full": w2.astype(jnp.bfloat16),
        "w3_full": w3.astype(jnp.bfloat16),
        "bn1_g": bn1_g, "bn1_b": bn1_b,
        "bn2_g": bn2_g, "bn2_b": bn2_b,
        "bn3_g": bn3_g, "bn3_b": bn3_b,
        "b1": b1, "b2": b2, "b3": b3,
    }


def actor_reference(states, p):
    """Pure-JAX reference mirroring the kernel's numerics (bf16 matmuls)."""
    def bn(x, g, b):
        mu = x.mean(0, keepdims=True)
        var = jnp.square(x - mu).mean(0, keepdims=True)
        scale = g * jax.lax.rsqrt(var + EPS)
        shift = b - mu * scale
        return x * scale + shift

    x = bn(states, p["bn1_g"], p["bn1_b"])
    x = jnp.maximum(jnp.dot(x.astype(jnp.bfloat16), p["w1_full"],
                            preferred_element_type=jnp.float32) + p["b1"], 0.0)
    x = bn(x, p["bn2_g"], p["bn2_b"])
    x = jnp.maximum(jnp.dot(x.astype(jnp.bfloat16), p["w2_full"],
                            preferred_element_type=jnp.float32) + p["b2"], 0.0)
    x = bn(x, p["bn3_g"], p["bn3_b"])
    return jnp.tanh(jnp.dot(x.astype(jnp.bfloat16), p["w3_full"],
                            preferred_element_type=jnp.float32) + p["b3"])


if __name__ == "__main__":
    key = jax.random.PRNGKey(0)
    k_param, k_state = jax.random.split(key)

    # Reacher-style sizes: 33-dim state, 4-dim action, default hidden [400, 300]
    # (padded internally to 512 / 384 / 128).
    batch, state_size, action_size = 8, 33, 4
    hidden_units = (400, 300)

    params = init_actor_params(k_param, state_size, action_size, hidden_units)
    states = jax.random.normal(k_state, (batch, state_size), jnp.float32)

    out = jax.block_until_ready(
        actor_forward(states, params, action_size=action_size))
    ref = jax.block_until_ready(actor_reference(states, params))

    assert out.shape == (batch, action_size)
    err = float(jnp.max(jnp.abs(out - ref)))
    assert jnp.allclose(out, ref, atol=2e-3, rtol=2e-3), err

    print("KERNEL_OK")
</pallas_src>

<mosaic_0001>
module attributes {stable_mosaic.version = 11 : i64} {
  func.func @actor_kernel(%arg0: memref<8x33xf32, #tpu.memory_space<vmem>>, %arg1: memref<33x512xbf16, #tpu.memory_space<vmem>>, %arg2: memref<512x384xbf16, #tpu.memory_space<any>>, %arg3: memref<384x128xbf16, #tpu.memory_space<any>>, %arg4: memref<9x512xf32, #tpu.memory_space<vmem>>, %arg5: memref<8x128xf32, #tpu.memory_space<vmem>>, %arg6: memref<512x384xbf16, #tpu.memory_space<vmem>>, %arg7: memref<384x128xbf16, #tpu.memory_space<vmem>>, %arg8: memref<2x!tpu.dma_semaphore, #tpu.memory_space<semaphore_mem>>) attributes {dimension_semantics = [], scalar_prefetch = 0 : i64, scratch_operands = 3 : i64, tpu.core_type = #tpu.core_type<tc>} {
    %c0_i32 = arith.constant 0 : i32
    %0 = tpu.memref_slice %arg8[%c0_i32] : memref<2x!tpu.dma_semaphore, #tpu.memory_space<semaphore_mem>> -> memref<1x!tpu.dma_semaphore, #tpu.memory_space<semaphore_mem>>
    %1 = tpu.memref_squeeze %0 : memref<1x!tpu.dma_semaphore, #tpu.memory_space<semaphore_mem>> -> memref<!tpu.dma_semaphore, #tpu.memory_space<semaphore_mem>>
    tpu.enqueue_dma source(%arg2 : memref<512x384xbf16, #tpu.memory_space<any>>) target(%arg6 : memref<512x384xbf16, #tpu.memory_space<vmem>>) target_semaphore(%1 : memref<!tpu.dma_semaphore, #tpu.memory_space<semaphore_mem>>)
    %c1_i32 = arith.constant 1 : i32
    %2 = tpu.memref_slice %arg8[%c1_i32] : memref<2x!tpu.dma_semaphore, #tpu.memory_space<semaphore_mem>> -> memref<1x!tpu.dma_semaphore, #tpu.memory_space<semaphore_mem>>
    %3 = tpu.memref_squeeze %2 : memref<1x!tpu.dma_semaphore, #tpu.memory_space<semaphore_mem>> -> memref<!tpu.dma_semaphore, #tpu.memory_space<semaphore_mem>>
    tpu.enqueue_dma source(%arg3 : memref<384x128xbf16, #tpu.memory_space<any>>) target(%arg7 : memref<384x128xbf16, #tpu.memory_space<vmem>>) target_semaphore(%3 : memref<!tpu.dma_semaphore, #tpu.memory_space<semaphore_mem>>)
    %c0 = arith.constant 0 : index
    %c0_0 = arith.constant 0 : index
    %4 = vector.load %arg0[%c0, %c0_0] : memref<8x33xf32, #tpu.memory_space<vmem>>, vector<8x33xf32>
    %c0_1 = arith.constant 0 : index
    %c0_2 = arith.constant 0 : index
    %5 = vector.load %arg4[%c0_1, %c0_2] : memref<9x512xf32, #tpu.memory_space<vmem>>, vector<1x33xf32>
    %c1 = arith.constant 1 : index
    %c0_3 = arith.constant 0 : index
    %6 = vector.load %arg4[%c1, %c0_3] : memref<9x512xf32, #tpu.memory_space<vmem>>, vector<1x33xf32>
    %c2 = arith.constant 2 : index
    %c0_4 = arith.constant 0 : index
    %7 = vector.load %arg4[%c2, %c0_4] : memref<9x512xf32, #tpu.memory_space<vmem>>, vector<1x512xf32>
    %c3 = arith.constant 3 : index
    %c0_5 = arith.constant 0 : index
    %8 = vector.load %arg4[%c3, %c0_5] : memref<9x512xf32, #tpu.memory_space<vmem>>, vector<1x512xf32>
    %c4 = arith.constant 4 : index
    %c0_6 = arith.constant 0 : index
    %9 = vector.load %arg4[%c4, %c0_6] : memref<9x512xf32, #tpu.memory_space<vmem>>, vector<1x512xf32>
    %c5 = arith.constant 5 : index
    %c0_7 = arith.constant 0 : index
    %10 = vector.load %arg4[%c5, %c0_7] : memref<9x512xf32, #tpu.memory_space<vmem>>, vector<1x384xf32>
    %c6 = arith.constant 6 : index
    %c0_8 = arith.constant 0 : index
    %11 = vector.load %arg4[%c6, %c0_8] : memref<9x512xf32, #tpu.memory_space<vmem>>, vector<1x384xf32>
    %c7 = arith.constant 7 : index
    %c0_9 = arith.constant 0 : index
    %12 = vector.load %arg4[%c7, %c0_9] : memref<9x512xf32, #tpu.memory_space<vmem>>, vector<1x384xf32>
    %c8 = arith.constant 8 : index
    %c0_10 = arith.constant 0 : index
    %13 = vector.load %arg4[%c8, %c0_10] : memref<9x512xf32, #tpu.memory_space<vmem>>, vector<1x128xf32>
    %cst = arith.constant dense<0.000000e+00> : vector<33xf32>
    %14 = vector.multi_reduction <add>, %4, %cst [0] : vector<8x33xf32> to vector<33xf32>
    %15 = vector.shape_cast %14 : vector<33xf32> to vector<1x33xf32>
    %cst_11 = arith.constant 8.000000e+00 : f32
    %16 = vector.broadcast %cst_11 : f32 to vector<1x33xf32>
    %17 = arith.divf %15, %16 : vector<1x33xf32>
    %18 = vector.broadcast %17 : vector<1x33xf32> to vector<8x33xf32>
    %19 = arith.subf %4, %18 : vector<8x33xf32>
    %20 = arith.mulf %19, %19 : vector<8x33xf32>
    %cst_12 = arith.constant dense<0.000000e+00> : vector<33xf32>
    %21 = vector.multi_reduction <add>, %20, %cst_12 [0] : vector<8x33xf32> to vector<33xf32>
    %22 = vector.shape_cast %21 : vector<33xf32> to vector<1x33xf32>
    %cst_13 = arith.constant 8.000000e+00 : f32
    %23 = vector.broadcast %cst_13 : f32 to vector<1x33xf32>
    %24 = arith.divf %22, %23 : vector<1x33xf32>
    %cst_14 = arith.constant 9.99999974E-6 : f32
    %25 = vector.broadcast %cst_14 : f32 to vector<1x33xf32>
    %26 = arith.addf %24, %25 : vector<1x33xf32>
    %27 = math.rsqrt %26 : vector<1x33xf32>
    %28 = arith.mulf %5, %27 : vector<1x33xf32>
    %29 = arith.mulf %17, %28 : vector<1x33xf32>
    %30 = arith.subf %6, %29 : vector<1x33xf32>
    %31 = vector.broadcast %28 : vector<1x33xf32> to vector<8x33xf32>
    %32 = arith.mulf %4, %31 : vector<8x33xf32>
    %33 = vector.broadcast %30 : vector<1x33xf32> to vector<8x33xf32>
    %34 = arith.addf %32, %33 : vector<8x33xf32>
    %35 = arith.truncf %34 : vector<8x33xf32> to vector<8x33xbf16>
    %c0_15 = arith.constant 0 : index
    %c0_16 = arith.constant 0 : index
    %36 = vector.load %arg1[%c0_15, %c0_16] : memref<33x512xbf16, #tpu.memory_space<vmem>>, vector<33x512xbf16>
    %cst_17 = arith.constant dense<0.000000e+00> : vector<8x512xf32>
    %37 = tpu.matmul %35, %36, %cst_17 {dimension_numbers = #tpu.dot_dimension_numbers<[1], [0], [0], [1], [0, 0, 1, 1], [], []>} : vector<8x33xbf16>, vector<33x512xbf16>, vector<8x512xf32> -> vector<8x512xf32>
    %38 = vector.broadcast %7 : vector<1x512xf32> to vector<8x512xf32>
    %39 = arith.addf %37, %38 : vector<8x512xf32>
    %cst_18 = arith.constant 0.000000e+00 : f32
    %40 = vector.broadcast %cst_18 : f32 to vector<8x512xf32>
    %41 = arith.maximumf %39, %40 : vector<8x512xf32>
    %cst_19 = arith.constant dense<0.000000e+00> : vector<512xf32>
    %42 = vector.multi_reduction <add>, %41, %cst_19 [0] : vector<8x512xf32> to vector<512xf32>
    %43 = vector.shape_cast %42 : vector<512xf32> to vector<1x512xf32>
    %cst_20 = arith.constant 8.000000e+00 : f32
    %44 = vector.broadcast %cst_20 : f32 to vector<1x512xf32>
    %45 = arith.divf %43, %44 : vector<1x512xf32>
    %46 = vector.broadcast %45 : vector<1x512xf32> to vector<8x512xf32>
    %47 = arith.subf %41, %46 : vector<8x512xf32>
    %48 = arith.mulf %47, %47 : vector<8x512xf32>
    %cst_21 = arith.constant dense<0.000000e+00> : vector<512xf32>
    %49 = vector.multi_reduction <add>, %48, %cst_21 [0] : vector<8x512xf32> to vector<512xf32>
    %50 = vector.shape_cast %49 : vector<512xf32> to vector<1x512xf32>
    %cst_22 = arith.constant 8.000000e+00 : f32
    %51 = vector.broadcast %cst_22 : f32 to vector<1x512xf32>
    %52 = arith.divf %50, %51 : vector<1x512xf32>
    %cst_23 = arith.constant 9.99999974E-6 : f32
    %53 = vector.broadcast %cst_23 : f32 to vector<1x512xf32>
    %54 = arith.addf %52, %53 : vector<1x512xf32>
    %55 = math.rsqrt %54 : vector<1x512xf32>
    %56 = arith.mulf %8, %55 : vector<1x512xf32>
    %57 = arith.mulf %45, %56 : vector<1x512xf32>
    %58 = arith.subf %9, %57 : vector<1x512xf32>
    %59 = vector.broadcast %56 : vector<1x512xf32> to vector<8x512xf32>
    %60 = arith.mulf %41, %59 : vector<8x512xf32>
    %61 = vector.broadcast %58 : vector<1x512xf32> to vector<8x512xf32>
    %62 = arith.addf %60, %61 : vector<8x512xf32>
    %c0_i32_24 = arith.constant 0 : i32
    %63 = tpu.memref_slice %arg8[%c0_i32_24] : memref<2x!tpu.dma_semaphore, #tpu.memory_space<semaphore_mem>> -> memref<1x!tpu.dma_semaphore, #tpu.memory_space<semaphore_mem>>
    %64 = tpu.memref_squeeze %63 : memref<1x!tpu.dma_semaphore, #tpu.memory_space<semaphore_mem>> -> memref<!tpu.dma_semaphore, #tpu.memory_space<semaphore_mem>>
    tpu.wait_dma2 semaphore(%64 : memref<!tpu.dma_semaphore, #tpu.memory_space<semaphore_mem>>) src(%arg2 : memref<512x384xbf16, #tpu.memory_space<any>>) dst(%arg6 : memref<512x384xbf16, #tpu.memory_space<vmem>>)
    %65 = arith.truncf %62 : vector<8x512xf32> to vector<8x512xbf16>
    %c0_25 = arith.constant 0 : index
    %c0_26 = arith.constant 0 : index
    %66 = vector.load %arg6[%c0_25, %c0_26] : memref<512x384xbf16, #tpu.memory_space<vmem>>, vector<512x384xbf16>
    %cst_27 = arith.constant dense<0.000000e+00> : vector<8x384xf32>
    %67 = tpu.matmul %65, %66, %cst_27 {dimension_numbers = #tpu.dot_dimension_numbers<[1], [0], [0], [1], [0, 0, 1, 1], [], []>} : vector<8x512xbf16>, vector<512x384xbf16>, vector<8x384xf32> -> vector<8x384xf32>
    %68 = vector.broadcast %10 : vector<1x384xf32> to vector<8x384xf32>
    %69 = arith.addf %67, %68 : vector<8x384xf32>
    %cst_28 = arith.constant 0.000000e+00 : f32
    %70 = vector.broadcast %cst_28 : f32 to vector<8x384xf32>
    %71 = arith.maximumf %69, %70 : vector<8x384xf32>
    %cst_29 = arith.constant dense<0.000000e+00> : vector<384xf32>
    %72 = vector.multi_reduction <add>, %71, %cst_29 [0] : vector<8x384xf32> to vector<384xf32>
    %73 = vector.shape_cast %72 : vector<384xf32> to vector<1x384xf32>
    %cst_30 = arith.constant 8.000000e+00 : f32
    %74 = vector.broadcast %cst_30 : f32 to vector<1x384xf32>
    %75 = arith.divf %73, %74 : vector<1x384xf32>
    %76 = vector.broadcast %75 : vector<1x384xf32> to vector<8x384xf32>
    %77 = arith.subf %71, %76 : vector<8x384xf32>
    %78 = arith.mulf %77, %77 : vector<8x384xf32>
    %cst_31 = arith.constant dense<0.000000e+00> : vector<384xf32>
    %79 = vector.multi_reduction <add>, %78, %cst_31 [0] : vector<8x384xf32> to vector<384xf32>
    %80 = vector.shape_cast %79 : vector<384xf32> to vector<1x384xf32>
    %cst_32 = arith.constant 8.000000e+00 : f32
    %81 = vector.broadcast %cst_32 : f32 to vector<1x384xf32>
    %82 = arith.divf %80, %81 : vector<1x384xf32>
    %cst_33 = arith.constant 9.99999974E-6 : f32
    %83 = vector.broadcast %cst_33 : f32 to vector<1x384xf32>
    %84 = arith.addf %82, %83 : vector<1x384xf32>
    %85 = math.rsqrt %84 : vector<1x384xf32>
    %86 = arith.mulf %11, %85 : vector<1x384xf32>
    %87 = arith.mulf %75, %86 : vector<1x384xf32>
    %88 = arith.subf %12, %87 : vector<1x384xf32>
    %89 = vector.broadcast %86 : vector<1x384xf32> to vector<8x384xf32>
    %90 = arith.mulf %71, %89 : vector<8x384xf32>
    %91 = vector.broadcast %88 : vector<1x384xf32> to vector<8x384xf32>
    %92 = arith.addf %90, %91 : vector<8x384xf32>
    %c1_i32_34 = arith.constant 1 : i32
    %93 = tpu.memref_slice %arg8[%c1_i32_34] : memref<2x!tpu.dma_semaphore, #tpu.memory_space<semaphore_mem>> -> memref<1x!tpu.dma_semaphore, #tpu.memory_space<semaphore_mem>>
    %94 = tpu.memref_squeeze %93 : memref<1x!tpu.dma_semaphore, #tpu.memory_space<semaphore_mem>> -> memref<!tpu.dma_semaphore, #tpu.memory_space<semaphore_mem>>
    tpu.wait_dma2 semaphore(%94 : memref<!tpu.dma_semaphore, #tpu.memory_space<semaphore_mem>>) src(%arg3 : memref<384x128xbf16, #tpu.memory_space<any>>) dst(%arg7 : memref<384x128xbf16, #tpu.memory_space<vmem>>)
    %95 = arith.truncf %92 : vector<8x384xf32> to vector<8x384xbf16>
    %c0_35 = arith.constant 0 : index
    %c0_36 = arith.constant 0 : index
    %96 = vector.load %arg7[%c0_35, %c0_36] : memref<384x128xbf16, #tpu.memory_space<vmem>>, vector<384x128xbf16>
    %cst_37 = arith.constant dense<0.000000e+00> : vector<8x128xf32>
    %97 = tpu.matmul %95, %96, %cst_37 {dimension_numbers = #tpu.dot_dimension_numbers<[1], [0], [0], [1], [0, 0, 1, 1], [], []>} : vector<8x384xbf16>, vector<384x128xbf16>, vector<8x128xf32> -> vector<8x128xf32>
    %98 = vector.broadcast %13 : vector<1x128xf32> to vector<8x128xf32>
    %99 = arith.addf %97, %98 : vector<8x128xf32>
    %100 = math.tanh %99 : vector<8x128xf32>
    %c0_38 = arith.constant 0 : index
    %c0_39 = arith.constant 0 : index
    %101 = vector.load %arg5[%c0_38, %c0_39] : memref<8x128xf32, #tpu.memory_space<vmem>>, vector<8x128xf32>
    tpu.vector_store %arg5[%c0_38, %c0_39], %100 {strides = array<i32>} : memref<8x128xf32, #tpu.memory_space<vmem>>, vector<8x128xf32>,
    return
  }
}

</mosaic_0001>

<bundles_post_ra>
// kernel: actor_forward.1
= control target key start
LH: loop header
LB: loop body
LE: loop exit
PB: predicated region body
PF: predicated region fallthrough
CT: control target
= control target key end

     0   :  { %10 = vsyncpa [#allocation6], 0  ;;  %s2686_s0 = inlined_call_operand.hbm [shape: f32[8,33], index: 0, kind: input, shape index: {}]   ;;  %s2687_s1 = inlined_call_operand.hbm [shape: bf16[33,512], index: 1, kind: input, shape index: {}]   ;;  %s2688_s2 = inlined_call_operand.hbm [shape: bf16[512,384], index: 2, kind: input, shape index: {}]   ;;  %s2689_s3 = inlined_call_operand.hbm [shape: bf16[384,128], index: 3, kind: input, shape index: {}]   ;;  %s2690_s4 = inlined_call_operand.hbm [shape: f32[9,512], index: 4, kind: input, shape index: {}]   ;;  %s2691_s5 = inlined_call_operand.vmem [shape: f32[8,128], index: 5, kind: output, shape index: {}]  }
   0x1   :  { %11 = vsyncpa [#allocation8], 0  ;;  %s27_s20 = sshll.u32 %s2687_s1, 4  ;;  %s2455_s21 = smov [#allocation7]   ;;  %s28_s20 = int_to_ptr.hbm [resolvable:$true] %s27_s20 }
   0x2   :  { %s29_s22 = sshll.u32 %s2455_s21, 4  ;;  %s17_s25 = sshll.u32 %s2686_s0, 4  ;;  %s30_s22 = int_to_ptr.vmem [resolvable:$true] %s29_s22  ;;  %s18_s25 = int_to_ptr.hbm [resolvable:$true] %s17_s25 }
   0x3   :  { %s2456_s26 = smov 256   ;;  %s2457_s27 = smov 16  }
   0x4   :  { %35 = dma.hbm_to_vmem [thread:$0]  %s28_s20, 1280, %s30_s22, [#allocation8], %s2456_s26, %s2456_s26, %s2457_s27  }
   0x5   :  { %s2458_s28 = smov [#allocation5]   ;;  %s40_s7 = sshll.u32 %s2690_s4, 4  ;;  %s41_s7 = int_to_ptr.hbm [resolvable:$true] %s40_s7 }
   0x6   :  { %s19_s29 = sshll.u32 %s2458_s28, 4  ;;  %s2459_s1 = smov [#allocation9]   ;;  %s20_s29 = int_to_ptr.vmem [resolvable:$true] %s19_s29 }
   0x7   :  { %22 = dma.hbm_to_vmem [thread:$0]  %s18_s25, 128, %s20_s29, [#allocation6]  }
   0x8   :  { %s42_s8 = sshll.u32 %s2459_s1, 4  ;;  %s2460_s9 = smov 512   ;;  %s43_s8 = int_to_ptr.vmem [resolvable:$true] %s42_s8 }
   0x9   :  { %s2461_s10 = smov 32  }
   0xa   :  { %48 = dma.hbm_to_vmem [thread:$0]  %s41_s7, 1024, %s43_s8, [#allocation8], %s2460_s9, %s2460_s9, %s2461_s10  }
   0xb   :  { %2447 = dma.done.wait [#allocation6], 128  }
   0xc   :  { %2448 = vsyncadd [#allocation6], 4294967168 }
   0xd   :  { %2449 = dma.done.wait [#allocation8], 2304  }
   0xe   :  { %2450 = vsyncadd [#allocation8], 4294964992  ;;  %vm220_vm0 = vcmask 1040384   ;;  %v2462_v0 = vmov 8.0   ;;  %v2511_v4 = vld [vmem:[#allocation9 + $0x20] ss:$0 sm:$0xff] }
   0xf   :  { %2307 = vrcp.f32 %v2462_v0  ;;  %v2505_v1 = vld [vmem:[#allocation9 + $0x5] ss:$8 sm:$0x7]  ;;  %v2507_v2 = vld [vmem:[#allocation9 + $0x6] ss:$8 sm:$0x7] }
  0x10   :  { %v2509_v3 = vld [vmem:[#allocation9 + $0x7] ss:$8 sm:$0x7]  ;;  %v156_v5 = vld [vmem:[#allocation7 + $0x40] sm:$0x11]  ;;  %v2463_v10 = vmov 0  }
  0x11   :  { %v2513_v6 = vld [vmem:[#allocation7 + $0x48] sm:$0x11]  ;;  %v193_v7 = vunpack.c.l.b16 %v156_v5  ;;  %v194_v8 = vunpack.c.h.b16 %v156_v5  ;;  %v2517_v11 = vsel %vm220_vm0, 65535, %v2463_v10  ;;  %v1668_v16 = vld [vmem:[#allocation7 + $0x20] sm:$0xf]  ;;  %v2519_v17 = vld [vmem:[#allocation5] sm:$0xff] }
  0x12   :  { %v195_v9 = vunpack.c.l.b16 %v2513_v6  ;;  %vm105_vm1 = vcmask 269312   ;;  %v2174_v18 = vld [vmem:[#allocation7 + $0x2c] sm:$0xf0]  ;;  %v2172_v19 = vld [vmem:[#allocation7 + $0x24] sm:$0xf]  ;;  %v196_v61 = vunpack.c.h.b16 %v2513_v6  ;;  %s69_s11 = sshll.u32 %s2688_s2, 4  ;;  %s70_s11 = int_to_ptr.hbm [resolvable:$true] %s69_s11 }
  0x13   :  { %v205_v13 = vpack.c.b16 %v193_v7, %v193_v7  ;;  %v206_v14 = vpack.c.b16 %v194_v8, %v194_v8  ;;  %v1670_v20 = vld [vmem:[#allocation7 + $0x30] sm:$0xf0]  ;;  %v1676_v24 = vld [vmem:[#allocation7 + $0x28] sm:$0xf]  ;;  %v2175_v25 = vld [vmem:[#allocation7 + $0x34] sm:$0xf0]  ;;  %v1669_v28 = vor.u32 %v2174_v18, %v1668_v16 }
  0x14   :  { %v207_v15 = vpack.c.b16 %v195_v9, %v195_v9  ;;  %v106_v26 = vsel %vm105_vm1, %v2519_v17, 0.0  ;;  %v1673_v29 = vor.u32 %v2172_v19, %v1670_v20  ;;  %v1652_v30 = vld [vmem:[#allocation7] sm:$0xf]  ;;  %v2170_v31 = vld [vmem:[#allocation7 + $0xc] sm:$0xf0]  ;;  %v1677_v33 = vor.u32 %v2175_v25, %v1676_v24  ;;  %s2464_s12 = smov [#allocation2]  }
  0x15   :  { %v2308_v12 = vpop.eup %2307  ;;  %v224_v21 = vand.u32 %v2517_v11, %v205_v13  ;;  %v227_v22 = vand.u32 %v2517_v11, %v206_v14  ;;  %v107_v32 = vrot.slane %v106_v26, 4  ;;  %v2168_v34 = vld [vmem:[#allocation7 + $0x4] sm:$0xf]  ;;  %v1654_v35 = vld [vmem:[#allocation7 + $0x10] sm:$0xf0]  ;;  %v1653_v41 = vor.u32 %v2170_v31, %v1652_v30  ;;  %s71_s13 = sshll.u32 %s2464_s12, 4  ;;  %s72_s13 = int_to_ptr.vmem [resolvable:$true] %s71_s13 }
  0x16   :  { %v230_v23 = vand.u32 %v2517_v11, %v207_v15  ;;  %v114_v27 = vmul.f32 8.0, %v2308_v12  ;;  %v1660_v37 = vld [vmem:[#allocation7 + $0x8] sm:$0xf]  ;;  %v2171_v38 = vld [vmem:[#allocation7 + $0x14] sm:$0xf0]  ;;  %v1657_v42 = vor.u32 %v2168_v34, %v1654_v35  ;;  %vm118_vm2 = vweird.f32 %v2308_v12  ;;  %s83_s16 = sshll.u32 %s2689_s3, 4  ;;  %s84_s16 = int_to_ptr.hbm [resolvable:$true] %s83_s16 }
  0x17   :  { %240 = vmatpush.bf16.msra.mxu3 %v224_v21  ;;  %253 = vmatpush.bf16.msra.mxu1 %v227_v22  ;;  %v108_v39 = vadd.f32 %v107_v32, %v106_v26  ;;  %v1661_v44 = vor.u32 %v2171_v38, %v1660_v37  ;;  %v208_v63 = vpack.c.b16 %v196_v61, %v196_v61  ;;  %v2173_v0 = vld [vmem:[#allocation7 + $0x2c] sm:$0xf]  ;;  %v1678_v5 = vld [vmem:[#allocation7 + $0x38] sm:$0xf0]  ;;  %v90_v18 = vld [vmem:[#allocation9] ss:$0 sm:$0xff] }
  0x18   :  { %266 = vmatpush.bf16.msra.mxu2 %v230_v23  ;;  %v115_v36 = vsub.f32 1.0, %v114_v27  ;;  %v1681_v8 = vor.u32 %v2173_v0, %v1678_v5  ;;  %v2169_v9 = vld [vmem:[#allocation7 + $0xc] sm:$0xf]  ;;  %v1662_v10 = vld [vmem:[#allocation7 + $0x18] sm:$0xf0]  ;;  %s2465_s17 = smov [#allocation3]  }
  0x19   :  { %v109_v43 = vrot.slane %v108_v39, 2  ;;  %v233_v7 = vand.u32 %v2517_v11, %v208_v63  ;;  %v1665_v13 = vor.u32 %v2169_v9, %v1662_v10  ;;  %v91_v11 = vld [vmem:[#allocation9 + $0x1] ss:$0 sm:$0xff]  ;;  %74 = dma.hbm_to_vmem [thread:$0]  %s70_s11, 12288, %s72_s13, [#allocation4] }
  0x1a   :  { %v116_v40 = vmul.f32 %v2308_v12, %v115_v36  ;;  %s85_s18 = sshll.u32 %s2465_s17, 4  ;;  %s86_s18 = int_to_ptr.vmem [resolvable:$true] %s85_s18 }
  0x1b   :  { %241 = vmatpush.bf16.msra.mxu3 %v1669_v28  ;;  %254 = vmatpush.bf16.msra.mxu1 %v1673_v29  ;;  %v110_v46 = vadd.f32 %v109_v43, %v108_v39  ;;  %88 = dma.hbm_to_vmem [thread:$0]  %s84_s16, 3072, %s86_s18, [#allocation4 + $0x1] }
  0x1c   :  { %267 = vmatpush.bf16.msra.mxu2 %v1677_v33  ;;  %v117_v45 = vadd.f32 %v2308_v12, %v116_v40 }
  0x1d   :  { %v111_v47 = vrot.slane %v110_v46, 1 }
  0x1e   :  { %v2526_v48 = vsel %vm118_vm2, %v2308_v12, %v117_v45 }
  0x1f   :  { %242 = vmatpush.bf16.msra.mxu3 %v1653_v41  ;;  %255 = vmatpush.bf16.msra.mxu1 %v1657_v42  ;;  %v112_v49 = vadd.f32 %v111_v47, %v110_v46 }
  0x20   :  { %268 = vmatpush.bf16.msra.mxu2 %v1661_v44 }
  0x21   :  { %v120_v50 = vmul.f32 %v2526_v48, %v112_v49 }
  0x23   :  { %v121_v51 = vsub.f32 %v2519_v17, %v120_v50  ;;  %279 = vmatpush.bf16.msrb.mxu3 %v233_v7 }
  0x25   :  { %v122_v52 = vmul.f32 %v121_v51, %v121_v51 }
  0x27   :  { %v123_v53 = vsel %vm105_vm1, %v122_v52, 0.0  ;;  %280 = vmatpush.bf16.msrb.mxu3 %v1681_v8 }
  0x28   :  { %v124_v54 = vrot.slane %v123_v53, 4 }
  0x2a   :  { %v125_v55 = vadd.f32 %v124_v54, %v123_v53 }
  0x2b   :  { %281 = vmatpush.bf16.msrb.mxu3 %v1665_v13 }
  0x2c   :  { %v126_v56 = vrot.slane %v125_v55, 2 }
  0x2e   :  { %v127_v57 = vadd.f32 %v126_v56, %v125_v55 }
  0x30   :  { %v128_v58 = vrot.slane %v127_v57, 1 }
  0x32   :  { %v129_v59 = vadd.f32 %v128_v58, %v127_v57 }
  0x34   :  { %v130_v60 = vmul.f32 %v129_v59, %v2526_v48 }
  0x36   :  { %v131_v62 = vadd.f32 1e-05, %v130_v60 }
  0x38   :  { %2309 = vrsqrt.f32 %v131_v62  ;;  %vm138_vm3 = vweird.f32 %v131_v62 }
  0x3e   :  { %v2310_v12 = vpop.eup %2309 }
  0x3f   :  { %v133_v14 = vmul.f32 %v2310_v12, %v131_v62  ;;  %vm139_vm4 = vweird.f32 %v2310_v12 }
  0x40   :  { %vm140_vm5 = vmor %vm138_vm3, %vm139_vm4  ;;  %vm407_vm3 = vcmask 1042434   ;;  %vm409_vm4 = vcmask 1041408  }
  0x41   :  { %v134_v15 = vmul.f32 %v2310_v12, %v133_v14 }
  0x43   :  { %v135_v16 = vmul.f32 0.5, %v134_v15 }
  0x45   :  { %v136_v6 = vsub.f32 1.5, %v135_v16 }
  0x47   :  { %v137_v19 = vmul.f32 %v2310_v12, %v136_v6 }
  0x49   :  { %v141_v20 = vsel %vm140_vm5, %v2310_v12, %v137_v19 }
  0x4a   :  { %v142_v21 = vmul.f32 %v141_v20, %v90_v18 }
  0x4c   :  { %v143_v22 = vmul.f32 %v142_v21, %v120_v50  ;;  %v145_v23 = vmul.f32 %v142_v21, %v2519_v17  ;;  %v93_v17 = vld [vmem:[#allocation9 + $0x2] ss:$8 sm:$0xf] }
  0x4d   :  { %v160_v27 = vperm.slane %v93_v17, 1  ;;  %v159_v31 = vperm.slane %v93_v17, 0  ;;  %v161_v32 = vperm.slane %v93_v17, 2  ;;  %v162_v60 = vperm.slane %v93_v17, 3 }
  0x4e   :  { %v144_v24 = vsub.f32 %v91_v11, %v143_v22 }
  0x50   :  { %v146_v25 = vadd.f32 %v145_v23, %v144_v24 }
  0x52   :  { %v147_v26 = vpack.c.bf16 %v146_v25, %v146_v25 }
  0x54   :  { %1682 = vmatmul.msk.bf16.vlgmr.msra.gmra.mxu3 %vm105_vm1, %v147_v26  ;;  %1683 = vmatmul.msk.bf16.vlgmr.msra.gmra.mxu1 %vm105_vm1, %v147_v26 }
  0x55   :  { %1684 = vmatmul.msk.bf16.vlgmr.msra.gmra.mxu2 %vm105_vm1, %v147_v26 }
  0x64   :  { %1685 = vmatmul.msk.bf16.vlgmr.msrb.gmra.mxu3 %vm105_vm1, %v147_v26 }
  0xd1   :  { %v257_v28 = vpop.f32.mrf.mxu1 }
  0xd2   :  { %v258_v29 = vadd.f32 %v257_v28, %v160_v27 }
  0xd4   :  { %v2545_v30 = vmax.f32 %v258_v29, 0.0 }
  0xd6   :  { %v297_v33 = vrot.slane %v2545_v30, 4 }
  0xd7   :  { %v244_v34 = vpop.f32.mrf.mxu3 }
  0xd8   :  { %v298_v35 = vadd.f32 %v297_v33, %v2545_v30  ;;  %v245_v36 = vadd.f32 %v244_v34, %v159_v31  ;;  %v270_v37 = vpop.f32.mrf.mxu2 }
  0xd9   :  { %v271_v38 = vadd.f32 %v270_v37, %v161_v32  ;;  %v259_v39 = vpop.f32.mrf.mxu1 }
  0xda   :  { %v299_v40 = vrot.slane %v298_v35, 2  ;;  %v2549_v41 = vmax.f32 %v245_v36, 0.0 }
  0xdb   :  { %v2551_v42 = vmax.f32 %v271_v38, 0.0 }
  0xdc   :  { %v300_v43 = vadd.f32 %v299_v40, %v298_v35  ;;  %v291_v44 = vrot.slane %v2549_v41, 4 }
  0xdd   :  { %v303_v45 = vrot.slane %v2551_v42, 4 }
  0xde   :  { %v301_v46 = vrot.slane %v300_v43, 1  ;;  %v292_v47 = vadd.f32 %v291_v44, %v2549_v41 }
  0xdf   :  { %v304_v49 = vadd.f32 %v303_v45, %v2551_v42  ;;  %v246_v50 = vpop.f32.mrf.mxu3 }
  0xe0   :  { %v302_v51 = vadd.f32 %v301_v46, %v300_v43  ;;  %v293_v52 = vrot.slane %v292_v47, 2  ;;  %v272_v53 = vpop.f32.mrf.mxu2 }
  0xe1   :  { %v305_v54 = vrot.slane %v304_v49, 2 }
  0xe2   :  { %v2558_v55 = vmul.f32 %v302_v51, %v2526_v48  ;;  %v294_v56 = vadd.f32 %v293_v52, %v292_v47 }
  0xe3   :  { %v306_v57 = vadd.f32 %v305_v54, %v304_v49 }
  0xe4   :  { %v320_v58 = vsub.f32 %v2545_v30, %v2558_v55  ;;  %v295_v59 = vrot.slane %v294_v56, 1 }
  0xe5   :  { %v307_v61 = vrot.slane %v306_v57, 1 }
  0xe6   :  { %v324_v62 = vmul.f32 %v320_v58, %v320_v58  ;;  %v296_v63 = vadd.f32 %v295_v59, %v294_v56 }
  0xe7   :  { %v308_v0 = vadd.f32 %v307_v61, %v306_v57  ;;  %v283_v5 = vpop.f32.mrf.mxu3 }
  0xe8   :  { %v333_v7 = vrot.slane %v324_v62, 4  ;;  %v2563_v8 = vmul.f32 %v296_v63, %v2526_v48  ;;  %v284_v9 = vadd.f32 %v283_v5, %v162_v60 }
  0xe9   :  { %v2566_v10 = vmul.f32 %v308_v0, %v2526_v48 }
  0xea   :  { %v334_v12 = vadd.f32 %v333_v7, %v324_v62  ;;  %v319_v13 = vsub.f32 %v2549_v41, %v2563_v8  ;;  %v2570_v14 = vmax.f32 %v284_v9, 0.0 }
  0xeb   :  { %v321_v15 = vsub.f32 %v2551_v42, %v2566_v10 }
  0xec   :  { %v335_v16 = vrot.slane %v334_v12, 2  ;;  %v323_v6 = vmul.f32 %v319_v13, %v319_v13  ;;  %v309_v18 = vrot.slane %v2570_v14, 4 }
  0xed   :  { %v325_v19 = vmul.f32 %v321_v15, %v321_v15 }
  0xee   :  { %v336_v20 = vadd.f32 %v335_v16, %v334_v12  ;;  %v327_v21 = vrot.slane %v323_v6, 4  ;;  %v310_v11 = vadd.f32 %v309_v18, %v2570_v14 }
  0xef   :  { %v339_v22 = vrot.slane %v325_v19, 4  ;;  %v285_v23 = vpop.f32.mrf.mxu3 }
  0xf0   :  { %v337_v24 = vrot.slane %v336_v20, 1  ;;  %v328_v25 = vadd.f32 %v327_v21, %v323_v6  ;;  %v311_v26 = vrot.slane %v310_v11, 2 }
  0xf1   :  { %v340_v17 = vadd.f32 %v339_v22, %v325_v19 }
  0xf2   :  { %v329_v27 = vrot.slane %v328_v25, 2  ;;  %v312_v28 = vadd.f32 %v311_v26, %v310_v11  ;;  %v338_v29 = vadd.f32 %v337_v24, %v336_v20 }
  0xf3   :  { %v341_v31 = vrot.slane %v340_v17, 2 }
  0xf4   :  { %v330_v32 = vadd.f32 %v329_v27, %v328_v25  ;;  %v313_v33 = vrot.slane %v312_v28, 1  ;;  %v352_v37 = vmul.f32 %v338_v29, %v2526_v48 }
  0xf5   :  { %v342_v34 = vadd.f32 %v341_v31, %v340_v17 }
  0xf6   :  { %v331_v35 = vrot.slane %v330_v32, 1  ;;  %v314_v36 = vadd.f32 %v313_v33, %v312_v28  ;;  %v356_v46 = vadd.f32 1e-05, %v352_v37  ;;  %v95_v37 = vld [vmem:[#allocation9 + $0x3] ss:$8 sm:$0xf] }
  0xf7   :  { %v343_v38 = vrot.slane %v342_v34, 1 }
  0xf8   :  { %v332_v39 = vadd.f32 %v331_v35, %v330_v32  ;;  %v2578_v40 = vmul.f32 %v314_v36, %v2526_v48  ;;  %2311 = vrsqrt.f32 %v356_v46  ;;  %vm375_vm8 = vweird.f32 %v356_v46 }
  0xf9   :  { %v344_v43 = vadd.f32 %v343_v38, %v342_v34 }
  0xfa   :  { %v351_v44 = vmul.f32 %v332_v39, %v2526_v48  ;;  %v322_v45 = vsub.f32 %v2570_v14, %v2578_v40 }
  0xfb   :  { %v353_v47 = vmul.f32 %v344_v43, %v2526_v48 }
  0xfc   :  { %v326_v49 = vmul.f32 %v322_v45, %v322_v45  ;;  %v355_v51 = vadd.f32 1e-05, %v351_v44 }
  0xfd   :  { %v357_v50 = vadd.f32 1e-05, %v353_v47 }
  0xfe   :  { %v345_v52 = vrot.slane %v326_v49, 4  ;;  %v2312_v57 = vpop.eup %2311  ;;  %vm365_vm13 = vweird.f32 %v355_v51 }
  0xff   :  { %2313 = vrsqrt.f32 %v357_v50  ;;  %v370_v62 = vmul.f32 %v2312_v57, %v356_v46  ;;  %vm376_vm6 = vweird.f32 %v2312_v57  ;;  %vm385_vm11 = vweird.f32 %v357_v50 }
 0x100   :  { %v346_v53 = vadd.f32 %v345_v52, %v326_v49  ;;  %2315 = vrsqrt.f32 %v355_v51  ;;  %vm2585_vm10 = vmor %vm375_vm8, %vm376_vm6 }
 0x101   :  { %v371_v9 = vmul.f32 %v2312_v57, %v370_v62 }
 0x102   :  { %v347_v54 = vrot.slane %v346_v53, 2 }
 0x103   :  { %v372_v15 = vmul.f32 0.5, %v371_v9 }
 0x104   :  { %v348_v56 = vadd.f32 %v347_v54, %v346_v53 }
 0x105   :  { %v2314_v58 = vpop.eup %2313  ;;  %v373_v19 = vsub.f32 1.5, %v372_v15 }
 0x106   :  { %v349_v59 = vrot.slane %v348_v56, 1  ;;  %v2316_v60 = vpop.eup %2315  ;;  %v380_v63 = vmul.f32 %v2314_v58, %v357_v50  ;;  %vm386_vm7 = vweird.f32 %v2314_v58 }
 0x107   :  { %v360_v5 = vmul.f32 %v2316_v60, %v355_v51  ;;  %v374_v23 = vmul.f32 %v2312_v57, %v373_v19  ;;  %vm366_vm9 = vweird.f32 %v2316_v60  ;;  %vm387_vm14 = vmor %vm385_vm11, %vm386_vm7 }
 0x108   :  { %v350_v61 = vadd.f32 %v349_v59, %v348_v56  ;;  %v381_v12 = vmul.f32 %v2314_v58, %v380_v63  ;;  %vm367_vm15 = vmor %vm365_vm13, %vm366_vm9 }
 0x109   :  { %v361_v13 = vmul.f32 %v2316_v60, %v360_v5  ;;  %v378_v28 = vsel %vm2585_vm10, %v2312_v57, %v374_v23 }
 0x10a   :  { %v354_v0 = vmul.f32 %v350_v61, %v2526_v48  ;;  %v382_v16 = vmul.f32 0.5, %v381_v12  ;;  %v403_v34 = vrot.slane %v378_v28, 7 }
 0x10b   :  { %v362_v6 = vmul.f32 0.5, %v361_v13 }
 0x10c   :  { %v358_v7 = vadd.f32 1e-05, %v354_v0  ;;  %v383_v20 = vsub.f32 1.5, %v382_v16 }
 0x10d   :  { %v363_v11 = vsub.f32 1.5, %v362_v6 }
 0x10e   :  { %2317 = vrsqrt.f32 %v358_v7  ;;  %v384_v24 = vmul.f32 %v2314_v58, %v383_v20  ;;  %vm395_vm1 = vweird.f32 %v358_v7 }
 0x10f   :  { %v364_v17 = vmul.f32 %v2316_v60, %v363_v11 }
 0x110   :  { %v388_v29 = vsel %vm387_vm14, %v2314_v58, %v384_v24  ;;  %v97_v58 = vld [vmem:[#allocation9 + $0x4] ss:$8 sm:$0xf] }
 0x111   :  { %v368_v32 = vsel %vm367_vm15, %v2316_v60, %v364_v17  ;;  %v404_v35 = vrot.slane %v388_v29, 6 }
 0x112   :  { %v406_v38 = vsel %vm220_vm0, %v368_v32, %v403_v34 }
 0x114   :  { %v2318_v18 = vpop.eup %2317 }
 0x115   :  { %v390_v21 = vmul.f32 %v2318_v18, %v358_v7  ;;  %vm396_vm12 = vweird.f32 %v2318_v18 }
 0x116   :  { %vm397_vm2 = vmor %vm395_vm1, %vm396_vm12 }
 0x117   :  { %v391_v22 = vmul.f32 %v2318_v18, %v390_v21 }
 0x119   :  { %v392_v25 = vmul.f32 0.5, %v391_v22 }
 0x11b   :  { %v393_v27 = vsub.f32 1.5, %v392_v25 }
 0x11d   :  { %v394_v31 = vmul.f32 %v2318_v18, %v393_v27 }
 0x11f   :  { %v398_v33 = vsel %vm397_vm2, %v2318_v18, %v394_v31 }
 0x120   :  { %v405_v36 = vrot.slane %v398_v33, 5 }
 0x122   :  { %v408_v39 = vsel %vm407_vm3, %v404_v35, %v405_v36 }
 0x123   :  { %v410_v43 = vsel %vm409_vm4, %v406_v38, %v408_v39 }
 0x124   :  { %v412_v44 = vmul.f32 %v410_v43, %v95_v37 }
 0x126   :  { %v414_v45 = vperm.slane %v412_v44, 0  ;;  %v415_v46 = vperm.slane %v412_v44, 1  ;;  %v416_v47 = vperm.slane %v412_v44, 2  ;;  %v417_v49 = vperm.slane %v412_v44, 3 }
 0x128   :  { %v423_v50 = vmul.f32 %v415_v46, %v2558_v55  ;;  %v424_v51 = vmul.f32 %v416_v47, %v2566_v10  ;;  %v425_v52 = vmul.f32 %v417_v49, %v2578_v40  ;;  %v422_v53 = vmul.f32 %v414_v45, %v2563_v8 }
 0x129   :  { %v438_v63 = vmul.f32 %v414_v45, %v2549_v41  ;;  %v439_v55 = vmul.f32 %v415_v46, %v2545_v30  ;;  %v440_v10 = vmul.f32 %v416_v47, %v2551_v42  ;;  %v441_v40 = vmul.f32 %v417_v49, %v2570_v14 }
 0x12a   :  { %v430_v54 = vrot.slane %v423_v50, 7  ;;  %v431_v56 = vrot.slane %v424_v51, 6  ;;  %v432_v57 = vrot.slane %v425_v52, 5 }
 0x12c   :  { %v433_v59 = vsel %vm220_vm0, %v422_v53, %v430_v54  ;;  %v434_v60 = vsel %vm407_vm3, %v431_v56, %v432_v57 }
 0x12d   :  { %v435_v61 = vsel %vm409_vm4, %v433_v59, %v434_v60 }
 0x12e   :  { %v437_v62 = vsub.f32 %v97_v58, %v435_v61 }
 0x130   :  { %v443_v8 = vperm.slane %v437_v62, 0  ;;  %v444_v0 = vperm.slane %v437_v62, 1  ;;  %v445_v5 = vperm.slane %v437_v62, 2  ;;  %v446_v7 = vperm.slane %v437_v62, 3 }
 0x132   :  { %v2605_v9 = vadd.f32 %v443_v8, %v438_v63  ;;  %v2607_v12 = vadd.f32 %v444_v0, %v439_v55  ;;  %v2609_v13 = vadd.f32 %v445_v5, %v440_v10  ;;  %v2611_v15 = vadd.f32 %v446_v7, %v441_v40 }
 0x133   :  { %2451 = dma.done.wait [#allocation4], 12288 }
 0x134   :  { %2452 = vsyncadd [#allocation4], 4294955008  ;;  %v1772_v41 = vld [vmem:[#allocation2 + $0xa8] sm:$0xf]  ;;  %v2198_v30 = vld [vmem:[#allocation2 + $0xb0] sm:$0xf0] }
 0x135   :  { %v1868_v16 = vld [vmem:[#allocation2 + $0x168] sm:$0xf]  ;;  %v1773_v42 = vor.u32 %v2198_v30, %v1772_v41  ;;  %v2222_v6 = vld [vmem:[#allocation2 + $0x170] sm:$0xf0]  ;;  %v1760_v22 = vld [vmem:[#allocation2 + $0x90] sm:$0xf] }
 0x136   :  { %v1964_v14 = vld [vmem:[#allocation2 + $0x228] sm:$0xf]  ;;  %v2246_v18 = vld [vmem:[#allocation2 + $0x230] sm:$0xf0]  ;;  %v1869_v19 = vor.u32 %v2222_v6, %v1868_v16  ;;  %v2195_v24 = vld [vmem:[#allocation2 + $0x98] sm:$0xf0] }
 0x137   :  { %v1965_v20 = vor.u32 %v2246_v18, %v1964_v14  ;;  %v2060_v21 = vld [vmem:[#allocation2 + $0x2e8] sm:$0xf]  ;;  %v2270_v11 = vld [vmem:[#allocation2 + $0x2f0] sm:$0xf0]  ;;  %1110 = vmatpush.bf16.msra.mxu0 %v1773_v42  ;;  %v1856_v25 = vld [vmem:[#allocation2 + $0x150] sm:$0xf]  ;;  %v1761_v17 = vor.u32 %v2195_v24, %v1760_v22 }
 0x138   :  { %v2061_v23 = vor.u32 %v2270_v11, %v2060_v21  ;;  %v2219_v26 = vld [vmem:[#allocation2 + $0x158] sm:$0xf0]  ;;  %1123 = vmatpush.bf16.msrb.mxu1 %v1869_v19  ;;  %v1952_v28 = vld [vmem:[#allocation2 + $0x210] sm:$0xf]  ;;  %v1748_v34 = vld [vmem:[#allocation2 + $0x78] sm:$0xf] }
 0x139   :  { %1136 = vmatpush.bf16.msrb.mxu2 %v1965_v20  ;;  %v1857_v27 = vor.u32 %v2219_v26, %v1856_v25  ;;  %v2243_v29 = vld [vmem:[#allocation2 + $0x218] sm:$0xf0]  ;;  %v2048_v31 = vld [vmem:[#allocation2 + $0x2d0] sm:$0xf]  ;;  %v2192_v35 = vld [vmem:[#allocation2 + $0x80] sm:$0xf0] }
 0x13a   :  { %1149 = vmatpush.bf16.msra.mxu3 %v2061_v23  ;;  %v1953_v32 = vor.u32 %v2243_v29, %v1952_v28  ;;  %v2267_v33 = vld [vmem:[#allocation2 + $0x2d8] sm:$0xf0]  ;;  %v1844_v37 = vld [vmem:[#allocation2 + $0x138] sm:$0xf]  ;;  %v2216_v38 = vld [vmem:[#allocation2 + $0x140] sm:$0xf0]  ;;  %v1749_v43 = vor.u32 %v2192_v35, %v1748_v34 }
 0x13b   :  { %v2049_v36 = vor.u32 %v2267_v33, %v2048_v31  ;;  %v1940_v39 = vld [vmem:[#allocation2 + $0x1f8] sm:$0xf]  ;;  %1111 = vmatpush.bf16.msra.mxu0 %v1761_v17  ;;  %v2240_v44 = vld [vmem:[#allocation2 + $0x200] sm:$0xf0]  ;;  %v1845_v47 = vor.u32 %v2216_v38, %v1844_v37  ;;  %v1736_v50 = vld [vmem:[#allocation2 + $0x60] sm:$0xf] }
 0x13c   :  { %v2036_v45 = vld [vmem:[#allocation2 + $0x2b8] sm:$0xf]  ;;  %v2264_v46 = vld [vmem:[#allocation2 + $0x2c0] sm:$0xf0]  ;;  %1124 = vmatpush.bf16.msrb.mxu1 %v1857_v27  ;;  %v1941_v49 = vor.u32 %v2240_v44, %v1940_v39  ;;  %v2189_v51 = vld [vmem:[#allocation2 + $0x68] sm:$0xf0] }
 0x13d   :  { %1137 = vmatpush.bf16.msrb.mxu2 %v1953_v32  ;;  %v1832_v52 = vld [vmem:[#allocation2 + $0x120] sm:$0xf]  ;;  %v2037_v53 = vor.u32 %v2264_v46, %v2036_v45  ;;  %v2213_v54 = vld [vmem:[#allocation2 + $0x128] sm:$0xf0]  ;;  %v1737_v60 = vor.u32 %v2189_v51, %v1736_v50  ;;  %v1724_v63 = vld [vmem:[#allocation2 + $0x48] sm:$0xf] }
 0x13e   :  { %1150 = vmatpush.bf16.msra.mxu3 %v2049_v36  ;;  %v1928_v56 = vld [vmem:[#allocation2 + $0x1e0] sm:$0xf]  ;;  %v2237_v57 = vld [vmem:[#allocation2 + $0x1e8] sm:$0xf0]  ;;  %v1833_v61 = vor.u32 %v2213_v54, %v1832_v52  ;;  %v2186_v55 = vld [vmem:[#allocation2 + $0x50] sm:$0xf0] }
 0x13f   :  { %v2024_v58 = vld [vmem:[#allocation2 + $0x2a0] sm:$0xf]  ;;  %v2261_v59 = vld [vmem:[#allocation2 + $0x2a8] sm:$0xf0]  ;;  %1112 = vmatpush.bf16.msra.mxu0 %v1749_v43  ;;  %v1929_v62 = vor.u32 %v2237_v57, %v1928_v56  ;;  %v1820_v10 = vld [vmem:[#allocation2 + $0x108] sm:$0xf]  ;;  %v1725_v30 = vor.u32 %v2186_v55, %v1724_v63 }
 0x140   :  { %1125 = vmatpush.bf16.msrb.mxu1 %v1845_v47  ;;  %v2025_v40 = vor.u32 %v2261_v59, %v2024_v58  ;;  %v2210_v8 = vld [vmem:[#allocation2 + $0x110] sm:$0xf0]  ;;  %v1916_v0 = vld [vmem:[#allocation2 + $0x1c8] sm:$0xf]  ;;  %v1712_v6 = vld [vmem:[#allocation2 + $0x30] sm:$0xf] }
 0x141   :  { %1138 = vmatpush.bf16.msrb.mxu2 %v1941_v49  ;;  %v2234_v5 = vld [vmem:[#allocation2 + $0x1d0] sm:$0xf0]  ;;  %v2012_v7 = vld [vmem:[#allocation2 + $0x288] sm:$0xf]  ;;  %v1821_v16 = vor.u32 %v2210_v8, %v1820_v10  ;;  %v2183_v14 = vld [vmem:[#allocation2 + $0x38] sm:$0xf0] }
 0x142   :  { %1151 = vmatpush.bf16.msra.mxu3 %v2037_v53  ;;  %v2258_v41 = vld [vmem:[#allocation2 + $0x290] sm:$0xf0]  ;;  %v1917_v42 = vor.u32 %v2234_v5, %v1916_v0  ;;  %v1808_v18 = vld [vmem:[#allocation2 + $0xf0] sm:$0xf]  ;;  %v2207_v20 = vld [vmem:[#allocation2 + $0xf8] sm:$0xf0]  ;;  %v1713_v24 = vor.u32 %v2183_v14, %v1712_v6  ;;  %v2619_v14 = vpack.c.bf16 %v2605_v9, %v2605_v9 }
 0x143   :  { %1113 = vmatpush.bf16.msra.mxu0 %v1737_v60  ;;  %v2013_v19 = vor.u32 %v2258_v41, %v2012_v7  ;;  %v1904_v21 = vld [vmem:[#allocation2 + $0x1b0] sm:$0xf]  ;;  %v2231_v11 = vld [vmem:[#allocation2 + $0x1b8] sm:$0xf0]  ;;  %v1809_v25 = vor.u32 %v2207_v20, %v1808_v18  ;;  %v1700_v17 = vld [vmem:[#allocation2 + $0x18] sm:$0xf]  ;;  %v2623_v18 = vpack.c.bf16 %v2611_v15, %v2611_v15 }
 0x144   :  { %1126 = vmatpush.bf16.msrb.mxu1 %v1833_v61  ;;  %v2000_v22 = vld [vmem:[#allocation2 + $0x270] sm:$0xf]  ;;  %v2255_v23 = vld [vmem:[#allocation2 + $0x278] sm:$0xf0]  ;;  %v1905_v26 = vor.u32 %v2231_v11, %v1904_v21  ;;  %v2180_v27 = vld [vmem:[#allocation2 + $0x20] sm:$0xf0] }
 0x145   :  { %1139 = vmatpush.bf16.msrb.mxu2 %v1929_v62  ;;  %v1796_v28 = vld [vmem:[#allocation2 + $0xd8] sm:$0xf]  ;;  %v2001_v29 = vor.u32 %v2255_v23, %v2000_v22  ;;  %v2204_v31 = vld [vmem:[#allocation2 + $0xe0] sm:$0xf0]  ;;  %v1701_v36 = vor.u32 %v2180_v27, %v1700_v17  ;;  %v1688_v37 = vld [vmem:[#allocation2] sm:$0xf] }
 0x146   :  { %1152 = vmatpush.bf16.msra.mxu3 %v2025_v40  ;;  %v1892_v32 = vld [vmem:[#allocation2 + $0x198] sm:$0xf]  ;;  %v2228_v33 = vld [vmem:[#allocation2 + $0x1a0] sm:$0xf0]  ;;  %v2177_v38 = vld [vmem:[#allocation2 + $0x8] sm:$0xf0]  ;;  %v1797_v39 = vor.u32 %v2204_v31, %v1796_v28 }
 0x147   :  { %1114 = vmatpush.bf16.msra.mxu0 %v1725_v30  ;;  %v1988_v34 = vld [vmem:[#allocation2 + $0x258] sm:$0xf]  ;;  %v2252_v35 = vld [vmem:[#allocation2 + $0x260] sm:$0xf0]  ;;  %v1893_v43 = vor.u32 %v2228_v33, %v1892_v32  ;;  %v1784_v44 = vld [vmem:[#allocation2 + $0xc0] sm:$0xf]  ;;  %v1689_v56 = vor.u32 %v2177_v38, %v1688_v37  ;;  %v2615_v30 = vpack.c.bf16 %v2609_v13, %v2609_v13  ;;  %v2627_v13 = vpack.c.bf16 %v2607_v12, %v2607_v12 }
 0x148   :  { %1127 = vmatpush.bf16.msrb.mxu1 %v1821_v16  ;;  %v2201_v45 = vld [vmem:[#allocation2 + $0xc8] sm:$0xf0]  ;;  %v1880_v46 = vld [vmem:[#allocation2 + $0x180] sm:$0xf]  ;;  %v1989_v47 = vor.u32 %v2252_v35, %v1988_v34  ;;  %v1774_v53 = vld [vmem:[#allocation2 + $0xb4] sm:$0xf0] }
 0x149   :  { %1140 = vmatpush.bf16.msrb.mxu2 %v1917_v42  ;;  %v2225_v49 = vld [vmem:[#allocation2 + $0x188] sm:$0xf0]  ;;  %v1976_v50 = vld [vmem:[#allocation2 + $0x240] sm:$0xf]  ;;  %v1870_v57 = vld [vmem:[#allocation2 + $0x174] sm:$0xf0]  ;;  %v1785_v60 = vor.u32 %v2201_v45, %v1784_v44 }
 0x14a   :  { %1153 = vmatpush.bf16.msra.mxu3 %v2013_v19  ;;  %v2249_v51 = vld [vmem:[#allocation2 + $0x248] sm:$0xf0]  ;;  %v1966_v59 = vld [vmem:[#allocation2 + $0x234] sm:$0xf0]  ;;  %v1881_v61 = vor.u32 %v2225_v49, %v1880_v46  ;;  %v2194_v0 = vld [vmem:[#allocation2 + $0x94] sm:$0xf] }
 0x14b   :  { %1115 = vmatpush.bf16.msra.mxu0 %v1713_v24  ;;  %v2197_v52 = vld [vmem:[#allocation2 + $0xac] sm:$0xf]  ;;  %v2062_v63 = vld [vmem:[#allocation2 + $0x2f4] sm:$0xf0]  ;;  %v1977_v55 = vor.u32 %v2249_v51, %v1976_v50  ;;  %v1762_v5 = vld [vmem:[#allocation2 + $0x9c] sm:$0xf0] }
 0x14c   :  { %1128 = vmatpush.bf16.msrb.mxu1 %v1809_v25  ;;  %v2221_v54 = vld [vmem:[#allocation2 + $0x16c] sm:$0xf]  ;;  %v1777_v10 = vor.u32 %v2197_v52, %v1774_v53  ;;  %v2218_v7 = vld [vmem:[#allocation2 + $0x154] sm:$0xf]  ;;  %v1858_v16 = vld [vmem:[#allocation2 + $0x15c] sm:$0xf0]  ;;  %v1765_v21 = vor.u32 %v2194_v0, %v1762_v5 }
 0x14d   :  { %1141 = vmatpush.bf16.msrb.mxu2 %v1905_v26  ;;  %v2245_v58 = vld [vmem:[#allocation2 + $0x22c] sm:$0xf]  ;;  %v1873_v40 = vor.u32 %v2221_v54, %v1870_v57  ;;  %v2242_v42 = vld [vmem:[#allocation2 + $0x214] sm:$0xf]  ;;  %v1954_v6 = vld [vmem:[#allocation2 + $0x21c] sm:$0xf0]  ;;  %v1861_v11 = vor.u32 %v2218_v7, %v1858_v16 }
 0x14e   :  { %1154 = vmatpush.bf16.msra.mxu3 %v2001_v29  ;;  %v2269_v62 = vld [vmem:[#allocation2 + $0x2ec] sm:$0xf]  ;;  %v1969_v8 = vor.u32 %v2245_v58, %v1966_v59  ;;  %v2266_v19 = vld [vmem:[#allocation2 + $0x2d4] sm:$0xf]  ;;  %v2050_v20 = vld [vmem:[#allocation2 + $0x2dc] sm:$0xf0]  ;;  %v1957_v22 = vor.u32 %v2242_v42, %v1954_v6 }
 0x14f   :  { %1116 = vmatpush.bf16.msra.mxu0 %v1701_v36  ;;  %v2065_v41 = vor.u32 %v2269_v62, %v2062_v63  ;;  %v2191_v23 = vld [vmem:[#allocation2 + $0x7c] sm:$0xf]  ;;  %v1750_v9 = vld [vmem:[#allocation2 + $0x84] sm:$0xf0]  ;;  %v2053_v15 = vor.u32 %v2266_v19, %v2050_v20  ;;  %v2188_v32 = vld [vmem:[#allocation2 + $0x64] sm:$0xf] }
 0x150   :  { %1129 = vmatpush.bf16.msrb.mxu1 %v1797_v39  ;;  %v2215_v24 = vld [vmem:[#allocation2 + $0x13c] sm:$0xf]  ;;  %v1846_v25 = vld [vmem:[#allocation2 + $0x144] sm:$0xf0]  ;;  %v1753_v28 = vor.u32 %v2191_v23, %v1750_v9  ;;  %v1738_v33 = vld [vmem:[#allocation2 + $0x6c] sm:$0xf0] }
 0x151   :  { %1142 = vmatpush.bf16.msrb.mxu2 %v1893_v43  ;;  %v2239_v26 = vld [vmem:[#allocation2 + $0x1fc] sm:$0xf]  ;;  %v1942_v17 = vld [vmem:[#allocation2 + $0x204] sm:$0xf0]  ;;  %v1849_v29 = vor.u32 %v2215_v24, %v1846_v25  ;;  %v2212_v34 = vld [vmem:[#allocation2 + $0x124] sm:$0xf]  ;;  %v1741_v44 = vor.u32 %v2188_v32, %v1738_v33 }
 0x152   :  { %1155 = vmatpush.bf16.msra.mxu3 %v1989_v47  ;;  %v2263_v12 = vld [vmem:[#allocation2 + $0x2bc] sm:$0xf]  ;;  %v2038_v27 = vld [vmem:[#allocation2 + $0x2c4] sm:$0xf0]  ;;  %v1945_v31 = vor.u32 %v2239_v26, %v1942_v17  ;;  %v1834_v36 = vld [vmem:[#allocation2 + $0x12c] sm:$0xf0] }
 0x153   :  { %1117 = vmatpush.bf16.msra.mxu0 %v1689_v56  ;;  %v2041_v35 = vor.u32 %v2263_v12, %v2038_v27  ;;  %v2236_v37 = vld [vmem:[#allocation2 + $0x1e4] sm:$0xf]  ;;  %v1930_v38 = vld [vmem:[#allocation2 + $0x1ec] sm:$0xf0]  ;;  %v1837_v45 = vor.u32 %v2212_v34, %v1834_v36  ;;  %v2185_v47 = vld [vmem:[#allocation2 + $0x4c] sm:$0xf] }
 0x154   :  { %1130 = vmatpush.bf16.msrb.mxu1 %v1785_v60  ;;  %v2260_v39 = vld [vmem:[#allocation2 + $0x2a4] sm:$0xf]  ;;  %v2026_v43 = vld [vmem:[#allocation2 + $0x2ac] sm:$0xf0]  ;;  %v1933_v46 = vor.u32 %v2236_v37, %v1930_v38  ;;  %v1726_v49 = vld [vmem:[#allocation2 + $0x54] sm:$0xf0] }
 0x155   :  { %1143 = vmatpush.bf16.msrb.mxu2 %v1881_v61  ;;  %v2209_v50 = vld [vmem:[#allocation2 + $0x10c] sm:$0xf]  ;;  %v2029_v51 = vor.u32 %v2260_v39, %v2026_v43  ;;  %v1822_v52 = vld [vmem:[#allocation2 + $0x114] sm:$0xf0]  ;;  %v1729_v58 = vor.u32 %v2185_v47, %v1726_v49  ;;  %v2182_v61 = vld [vmem:[#allocation2 + $0x34] sm:$0xf] }
 0x156   :  { %1156 = vmatpush.bf16.msra.mxu3 %v1977_v55  ;;  %1118 = vmatmul.bf16.vlgmr.msra.gmra.mxu0 %v2619_v14  ;;  %v2233_v53 = vld [vmem:[#allocation2 + $0x1cc] sm:$0xf]  ;;  %v1918_v54 = vld [vmem:[#allocation2 + $0x1d4] sm:$0xf0]  ;;  %v1825_v59 = vor.u32 %v2209_v50, %v1822_v52  ;;  %v1714_v62 = vld [vmem:[#allocation2 + $0x3c] sm:$0xf0] }
 0x157   :  { %1162 = vmatpush.bf16.msrb.mxu0 %v1777_v10  ;;  %1131 = vmatmul.bf16.vlgmr.msrb.gmra.mxu1 %v2627_v13  ;;  %v2257_v56 = vld [vmem:[#allocation2 + $0x28c] sm:$0xf]  ;;  %v2014_v57 = vld [vmem:[#allocation2 + $0x294] sm:$0xf0]  ;;  %v1921_v60 = vor.u32 %v2233_v53, %v1918_v54  ;;  %v2206_v63 = vld [vmem:[#allocation2 + $0xf4] sm:$0xf]  ;;  %v1717_v7 = vor.u32 %v2182_v61, %v1714_v62 }
 0x158   :  { %1175 = vmatpush.bf16.msra.mxu1 %v1873_v40  ;;  %1144 = vmatmul.bf16.vlgmr.msrb.gmra.mxu2 %v2615_v30  ;;  %v2017_v55 = vor.u32 %v2257_v56, %v2014_v57  ;;  %v1810_v10 = vld [vmem:[#allocation2 + $0xfc] sm:$0xf0]  ;;  %v2230_v40 = vld [vmem:[#allocation2 + $0x1b4] sm:$0xf]  ;;  %v2179_v42 = vld [vmem:[#allocation2 + $0x1c] sm:$0xf] }
 0x159   :  { %1188 = vmatpush.bf16.msra.mxu2 %v1969_v8  ;;  %1157 = vmatmul.bf16.vlgmr.msra.gmra.mxu3 %v2623_v18  ;;  %v1906_v8 = vld [vmem:[#allocation2 + $0x1bc] sm:$0xf0]  ;;  %v2254_v0 = vld [vmem:[#allocation2 + $0x274] sm:$0xf]  ;;  %v1702_v6 = vld [vmem:[#allocation2 + $0x24] sm:$0xf0] }
 0x15a   :  { %1201 = vmatpush.bf16.msrb.mxu3 %v2065_v41  ;;  %v2002_v5 = vld [vmem:[#allocation2 + $0x27c] sm:$0xf0]  ;;  %v1813_v41 = vor.u32 %v2206_v63, %v1810_v10  ;;  %v1909_v16 = vor.u32 %v2230_v40, %v1906_v8  ;;  %v2203_v19 = vld [vmem:[#allocation2 + $0xdc] sm:$0xf]  ;;  %v1990_v9 = vld [vmem:[#allocation2 + $0x264] sm:$0xf0]  ;;  %v1705_v24 = vor.u32 %v2179_v42, %v1702_v6 }
 0x15b   :  { %1163 = vmatpush.bf16.msrb.mxu0 %v1765_v21  ;;  %v2005_v20 = vor.u32 %v2254_v0, %v2002_v5  ;;  %v1798_v21 = vld [vmem:[#allocation2 + $0xe4] sm:$0xf0]  ;;  %v2251_v23 = vld [vmem:[#allocation2 + $0x25c] sm:$0xf]  ;;  %v1690_v25 = vld [vmem:[#allocation2 + $0xc] sm:$0xf0] }
 0x15c   :  { %1176 = vmatpush.bf16.msra.mxu1 %v1861_v11  ;;  %v2227_v11 = vld [vmem:[#allocation2 + $0x19c] sm:$0xf]  ;;  %v1801_v26 = vor.u32 %v2203_v19, %v1798_v21  ;;  %v2200_v12 = vld [vmem:[#allocation2 + $0xc4] sm:$0xf]  ;;  %v1786_v27 = vld [vmem:[#allocation2 + $0xcc] sm:$0xf0] }
 0x15d   :  { %1189 = vmatpush.bf16.msra.mxu2 %v1957_v22  ;;  %v1894_v22 = vld [vmem:[#allocation2 + $0x1a4] sm:$0xf0]  ;;  %v2248_v32 = vld [vmem:[#allocation2 + $0x244] sm:$0xf]  ;;  %v1978_v33 = vld [vmem:[#allocation2 + $0x24c] sm:$0xf0] }
 0x15e   :  { %1202 = vmatpush.bf16.msrb.mxu3 %v2053_v15  ;;  %v2176_v15 = vld [vmem:[#allocation2 + $0x4] sm:$0xf]  ;;  %v1897_v17 = vor.u32 %v2227_v11, %v1894_v22  ;;  %v1780_v34 = vld [vmem:[#allocation2 + $0xb0] sm:$0xf]  ;;  %v2223_v38 = vld [vmem:[#allocation2 + $0x178] sm:$0xf0]  ;;  %v1981_v49 = vor.u32 %v2248_v32, %v1978_v33 }
 0x15f   :  { %1164 = vmatpush.bf16.msrb.mxu0 %v1753_v28  ;;  %v2224_v28 = vld [vmem:[#allocation2 + $0x184] sm:$0xf]  ;;  %v1876_v36 = vld [vmem:[#allocation2 + $0x170] sm:$0xf]  ;;  %v1693_v37 = vor.u32 %v2176_v15, %v1690_v25  ;;  %v2247_v43 = vld [vmem:[#allocation2 + $0x238] sm:$0xf0] }
 0x160   :  { %1177 = vmatpush.bf16.msra.mxu1 %v1849_v29  ;;  %v1993_v29 = vor.u32 %v2251_v23, %v1990_v9  ;;  %v1972_v39 = vld [vmem:[#allocation2 + $0x230] sm:$0xf]  ;;  %v2271_v47 = vld [vmem:[#allocation2 + $0x2f8] sm:$0xf0]  ;;  %v1768_v53 = vld [vmem:[#allocation2 + $0x98] sm:$0xf] }
 0x161   :  { %1190 = vmatpush.bf16.msra.mxu2 %v1945_v31  ;;  %v1882_v31 = vld [vmem:[#allocation2 + $0x18c] sm:$0xf0]  ;;  %v1973_v52 = vor.u32 %v2247_v43, %v1972_v39  ;;  %v2196_v54 = vld [vmem:[#allocation2 + $0xa0] sm:$0xf0]  ;;  %v1864_v56 = vld [vmem:[#allocation2 + $0x158] sm:$0xf] }
 0x162   :  { %1203 = vmatpush.bf16.msrb.mxu3 %v2041_v35  ;;  %v2199_v35 = vld [vmem:[#allocation2 + $0xb8] sm:$0xf0]  ;;  %v2056_v61 = vld [vmem:[#allocation2 + $0x2d8] sm:$0xf]  ;;  %v2268_v62 = vld [vmem:[#allocation2 + $0x2e0] sm:$0xf0]  ;;  %v1769_v63 = vor.u32 %v2196_v54, %v1768_v53 }
 0x163   :  { %1165 = vmatpush.bf16.msrb.mxu0 %v1741_v44  ;;  %v1789_v44 = vor.u32 %v2200_v12, %v1786_v27  ;;  %v1781_v50 = vor.u32 %v2199_v35, %v1780_v34  ;;  %v1756_v40 = vld [vmem:[#allocation2 + $0x80] sm:$0xf]  ;;  %v2193_v8 = vld [vmem:[#allocation2 + $0x88] sm:$0xf0]  ;;  %v2057_v5 = vor.u32 %v2268_v62, %v2056_v61  ;;  %v1744_v11 = vld [vmem:[#allocation2 + $0x68] sm:$0xf] }
 0x164   :  { %1178 = vmatpush.bf16.msra.mxu1 %v1837_v45  ;;  %v1885_v45 = vor.u32 %v2224_v28, %v1882_v31  ;;  %v1852_v0 = vld [vmem:[#allocation2 + $0x140] sm:$0xf]  ;;  %v2265_v6 = vld [vmem:[#allocation2 + $0x2c8] sm:$0xf0]  ;;  %v1757_v19 = vor.u32 %v2193_v8, %v1756_v40  ;;  %v2190_v22 = vld [vmem:[#allocation2 + $0x70] sm:$0xf0] }
 0x165   :  { %1191 = vmatpush.bf16.msra.mxu2 %v1933_v46  ;;  %v2068_v46 = vld [vmem:[#allocation2 + $0x2f0] sm:$0xf]  ;;  %v2044_v42 = vld [vmem:[#allocation2 + $0x2c0] sm:$0xf]  ;;  %v1840_v23 = vld [vmem:[#allocation2 + $0x128] sm:$0xf]  ;;  %v1745_v12 = vor.u32 %v2190_v22, %v1744_v11 }
 0x166   :  { %1204 = vmatpush.bf16.msrb.mxu3 %v2029_v51  ;;  %v1877_v51 = vor.u32 %v2223_v38, %v1876_v36  ;;  %v2069_v57 = vor.u32 %v2271_v47, %v2068_v46  ;;  %v2045_v9 = vor.u32 %v2265_v6, %v2044_v42  ;;  %v1936_v15 = vld [vmem:[#allocation2 + $0x1e8] sm:$0xf]  ;;  %v2238_v25 = vld [vmem:[#allocation2 + $0x1f0] sm:$0xf0]  ;;  %v2187_v31 = vld [vmem:[#allocation2 + $0x58] sm:$0xf0] }
 0x167   :  { %1166 = vmatpush.bf16.msrb.mxu0 %v1729_v58  ;;  %v2220_v58 = vld [vmem:[#allocation2 + $0x160] sm:$0xf0]  ;;  %v1937_v28 = vor.u32 %v2238_v25, %v1936_v15  ;;  %v1828_v32 = vld [vmem:[#allocation2 + $0x110] sm:$0xf]  ;;  %v2211_v34 = vld [vmem:[#allocation2 + $0x118] sm:$0xf0] }
 0x168   :  { %1179 = vmatpush.bf16.msra.mxu1 %v1825_v59  ;;  %v1960_v59 = vld [vmem:[#allocation2 + $0x218] sm:$0xf]  ;;  %v1924_v35 = vld [vmem:[#allocation2 + $0x1d0] sm:$0xf]  ;;  %v2235_v36 = vld [vmem:[#allocation2 + $0x1d8] sm:$0xf0]  ;;  %v1829_v43 = vor.u32 %v2211_v34, %v1828_v32 }
 0x169   :  { %1192 = vmatpush.bf16.msra.mxu2 %v1921_v60  ;;  %v2244_v60 = vld [vmem:[#allocation2 + $0x220] sm:$0xf0]  ;;  %v2259_v38 = vld [vmem:[#allocation2 + $0x298] sm:$0xf0]  ;;  %v1816_v47 = vld [vmem:[#allocation2 + $0xf8] sm:$0xf] }
 0x16a   :  { %1205 = vmatpush.bf16.msrb.mxu3 %v2017_v55  ;;  %v1865_v55 = vor.u32 %v2220_v58, %v1864_v56  ;;  %v1961_v10 = vor.u32 %v2244_v60, %v1960_v59  ;;  %v2184_v46 = vld [vmem:[#allocation2 + $0x40] sm:$0xf0]  ;;  %v2008_v53 = vld [vmem:[#allocation2 + $0x278] sm:$0xf]  ;;  %v1708_v59 = vld [vmem:[#allocation2 + $0x20] sm:$0xf] }
 0x16b   :  { %1167 = vmatpush.bf16.msrb.mxu0 %v1717_v7  ;;  %v2217_v7 = vld [vmem:[#allocation2 + $0x148] sm:$0xf0]  ;;  %v2256_v54 = vld [vmem:[#allocation2 + $0x280] sm:$0xf0]  ;;  %v1804_v61 = vld [vmem:[#allocation2 + $0xe0] sm:$0xf] }
 0x16c   :  { %1180 = vmatpush.bf16.msra.mxu1 %v1813_v41  ;;  %v1948_v41 = vld [vmem:[#allocation2 + $0x200] sm:$0xf]  ;;  %v2181_v60 = vld [vmem:[#allocation2 + $0x28] sm:$0xf0]  ;;  %v2009_v62 = vor.u32 %v2256_v54, %v2008_v53  ;;  %v1792_v42 = vld [vmem:[#allocation2 + $0xc8] sm:$0xf] }
 0x16d   :  { %1193 = vmatpush.bf16.msra.mxu2 %v1909_v16  ;;  %v2241_v16 = vld [vmem:[#allocation2 + $0x208] sm:$0xf0]  ;;  %v1996_v40 = vld [vmem:[#allocation2 + $0x260] sm:$0xf]  ;;  %v1984_v11 = vld [vmem:[#allocation2 + $0x248] sm:$0xf] }
 0x16e   :  { %1206 = vmatpush.bf16.msrb.mxu3 %v2005_v20  ;;  %v1853_v20 = vor.u32 %v2217_v7, %v1852_v0  ;;  %v1949_v21 = vor.u32 %v2241_v16, %v1948_v41  ;;  %v2253_v8 = vld [vmem:[#allocation2 + $0x268] sm:$0xf0]  ;;  %v1709_v0 = vor.u32 %v2181_v60, %v1708_v59  ;;  %v1696_v41 = vld [vmem:[#allocation2 + $0x8] sm:$0xf]  ;;  %v2178_v16 = vld [vmem:[#allocation2 + $0x10] sm:$0xf0] }
 0x16f   :  { %1168 = vmatpush.bf16.msrb.mxu0 %v1705_v24  ;;  %v2214_v24 = vld [vmem:[#allocation2 + $0x130] sm:$0xf0]  ;;  %v1997_v6 = vor.u32 %v2253_v8, %v1996_v40 }
 0x170   :  { %1181 = vmatpush.bf16.msra.mxu1 %v1801_v26  ;;  %v2032_v26 = vld [vmem:[#allocation2 + $0x2a8] sm:$0xf]  ;;  %v1841_v27 = vor.u32 %v2214_v24, %v1840_v23  ;;  %v2250_v22 = vld [vmem:[#allocation2 + $0x250] sm:$0xf0]  ;;  %v1697_v23 = vor.u32 %v2178_v16, %v1696_v41 }
 0x171   :  { %1194 = vmatpush.bf16.msra.mxu2 %v1897_v17  ;;  %v2262_v17 = vld [vmem:[#allocation2 + $0x2b0] sm:$0xf0]  ;;  %v1985_v15 = vor.u32 %v2250_v22, %v1984_v11 }
 0x172   :  { %1207 = vmatpush.bf16.msrb.mxu3 %v1993_v29  ;;  %v1732_v29 = vld [vmem:[#allocation2 + $0x50] sm:$0xf]  ;;  %v2033_v33 = vor.u32 %v2262_v17, %v2032_v26  ;;  %v592_v17 = vperm.slane %v2505_v1, 0 }
 0x173   :  { %1169 = vmatpush.bf16.msrb.mxu0 %v1693_v37  ;;  %v2020_v37 = vld [vmem:[#allocation2 + $0x290] sm:$0xf]  ;;  %v1733_v39 = vor.u32 %v2187_v31, %v1732_v29 }
 0x174   :  { %1182 = vmatpush.bf16.msra.mxu1 %v1789_v44  ;;  %v1925_v44 = vor.u32 %v2235_v36, %v1924_v35 }
 0x175   :  { %1195 = vmatpush.bf16.msra.mxu2 %v1885_v45  ;;  %v1720_v45 = vld [vmem:[#allocation2 + $0x38] sm:$0xf] }
 0x176   :  { %1208 = vmatpush.bf16.msrb.mxu3 %v1981_v49  ;;  %1170 = vmatmul.bf16.vlgmr.msrb.gmra.mxu0 %v2619_v14  ;;  %v2021_v49 = vor.u32 %v2259_v38, %v2020_v37  ;;  %v1721_v56 = vor.u32 %v2184_v46, %v1720_v45 }
 0x177   :  { %1214 = vmatpush.bf16.msra.mxu0 %v1781_v50  ;;  %1183 = vmatmul.bf16.vlgmr.msra.gmra.mxu1 %v2627_v13  ;;  %v2208_v50 = vld [vmem:[#allocation2 + $0x100] sm:$0xf0] }
 0x178   :  { %1227 = vmatpush.bf16.msrb.mxu1 %v1877_v51  ;;  %1196 = vmatmul.bf16.vlgmr.msra.gmra.mxu2 %v2615_v30  ;;  %v1912_v51 = vld [vmem:[#allocation2 + $0x1b8] sm:$0xf] }
 0x179   :  { %1240 = vmatpush.bf16.msrb.mxu2 %v1973_v52  ;;  %1209 = vmatmul.bf16.vlgmr.msrb.gmra.mxu3 %v2623_v18  ;;  %v2232_v52 = vld [vmem:[#allocation2 + $0x1c0] sm:$0xf0] }
 0x17a   :  { %1253 = vmatpush.bf16.msra.mxu3 %v2069_v57  ;;  %v1817_v57 = vor.u32 %v2208_v50, %v1816_v47  ;;  %v1913_v58 = vor.u32 %v2232_v52, %v1912_v51 }
 0x17b   :  { %1215 = vmatpush.bf16.msra.mxu0 %v1769_v63  ;;  %v2205_v63 = vld [vmem:[#allocation2 + $0xe8] sm:$0xf0] }
 0x17c   :  { %1228 = vmatpush.bf16.msrb.mxu1 %v1865_v55  ;;  %v1900_v55 = vld [vmem:[#allocation2 + $0x1a0] sm:$0xf] }
 0x17d   :  { %1241 = vmatpush.bf16.msrb.mxu2 %v1961_v10  ;;  %v2229_v10 = vld [vmem:[#allocation2 + $0x1a8] sm:$0xf0] }
 0x17e   :  { %1254 = vmatpush.bf16.msra.mxu3 %v2057_v5  ;;  %v1805_v5 = vor.u32 %v2205_v63, %v1804_v61  ;;  %v1901_v7 = vor.u32 %v2229_v10, %v1900_v55 }
 0x17f   :  { %1216 = vmatpush.bf16.msra.mxu0 %v1757_v19  ;;  %v2202_v19 = vld [vmem:[#allocation2 + $0xd0] sm:$0xf0] }
 0x180   :  { %1229 = vmatpush.bf16.msrb.mxu1 %v1853_v20  ;;  %v1888_v20 = vld [vmem:[#allocation2 + $0x188] sm:$0xf] }
 0x181   :  { %1242 = vmatpush.bf16.msrb.mxu2 %v1949_v21  ;;  %v2226_v21 = vld [vmem:[#allocation2 + $0x190] sm:$0xf0] }
 0x182   :  { %1255 = vmatpush.bf16.msra.mxu3 %v2045_v9  ;;  %v1793_v9 = vor.u32 %v2202_v19, %v1792_v42  ;;  %v1889_v24 = vor.u32 %v2226_v21, %v1888_v20 }
 0x183   :  { %1217 = vmatpush.bf16.msra.mxu0 %v1745_v12 }
 0x184   :  { %1230 = vmatpush.bf16.msrb.mxu1 %v1841_v27 }
 0x185   :  { %1243 = vmatpush.bf16.msrb.mxu2 %v1937_v28 }
 0x186   :  { %1256 = vmatpush.bf16.msra.mxu3 %v2033_v33 }
 0x187   :  { %1218 = vmatpush.bf16.msra.mxu0 %v1733_v39 }
 0x188   :  { %1231 = vmatpush.bf16.msrb.mxu1 %v1829_v43 }
 0x189   :  { %1244 = vmatpush.bf16.msrb.mxu2 %v1925_v44 }
 0x18a   :  { %1257 = vmatpush.bf16.msra.mxu3 %v2021_v49 }
 0x18b   :  { %1219 = vmatpush.bf16.msra.mxu0 %v1721_v56 }
 0x18c   :  { %1232 = vmatpush.bf16.msrb.mxu1 %v1817_v57 }
 0x18d   :  { %1245 = vmatpush.bf16.msrb.mxu2 %v1913_v58 }
 0x18e   :  { %1258 = vmatpush.bf16.msra.mxu3 %v2009_v62 }
 0x18f   :  { %1220 = vmatpush.bf16.msra.mxu0 %v1709_v0  ;;  %v594_v0 = vperm.slane %v2505_v1, 2 }
 0x190   :  { %1233 = vmatpush.bf16.msrb.mxu1 %v1805_v5 }
 0x191   :  { %1246 = vmatpush.bf16.msrb.mxu2 %v1901_v7 }
 0x192   :  { %1259 = vmatpush.bf16.msra.mxu3 %v1997_v6 }
 0x193   :  { %1221 = vmatpush.bf16.msra.mxu0 %v1697_v23 }
 0x194   :  { %1234 = vmatpush.bf16.msrb.mxu1 %v1793_v9 }
 0x195   :  { %1247 = vmatpush.bf16.msrb.mxu2 %v1889_v24 }
 0x196   :  { %1260 = vmatpush.bf16.msra.mxu3 %v1985_v15  ;;  %1222 = vmatmul.bf16.vlgmr.msra.gmra.mxu0 %v2619_v14 }
 0x197   :  { %1235 = vmatmul.bf16.vlgmr.msrb.gmra.mxu1 %v2627_v13 }
 0x198   :  { %1248 = vmatmul.bf16.vlgmr.msrb.gmra.mxu2 %v2615_v30 }
 0x199   :  { %1261 = vmatmul.bf16.vlgmr.msra.gmra.mxu3 %v2623_v18  ;;  %v593_v18 = vperm.slane %v2505_v1, 1 }
 0x1d3   :  { %v1119_v25 = vpop.f32.mrf.mxu0 }
 0x1d4   :  { %v1132_v26 = vpop.f32.mrf.mxu1  ;;  %v1120_v28 = vadd.f32 %v1119_v25, %v592_v17 }
 0x1d6   :  { %v1133_v32 = vadd.f32 %v1132_v26, %v1120_v28 }
 0x1db   :  { %v1145_v12 = vpop.f32.mrf.mxu2  ;;  %v1121_v29 = vpop.f32.mrf.mxu0 }
 0x1dc   :  { %v1158_v27 = vpop.f32.mrf.mxu3  ;;  %v1134_v31 = vpop.f32.mrf.mxu1  ;;  %v1146_v35 = vadd.f32 %v1145_v12, %v1133_v32 }
 0x1de   :  { %v1159_v14 = vadd.f32 %v1158_v27, %v1146_v35 }
 0x1e0   :  { %v2642_v36 = vmax.f32 %v1159_v14, 0.0 }
 0x1e2   :  { %v1269_v30 = vrot.slane %v2642_v36, 4 }
 0x1e3   :  { %v1147_v33 = vpop.f32.mrf.mxu2 }
 0x1e4   :  { %v1160_v34 = vpop.f32.mrf.mxu3  ;;  %v1270_v37 = vadd.f32 %v1269_v30, %v2642_v36 }
 0x1e6   :  { %v1271_v44 = vrot.slane %v1270_v37, 2 }
 0x1e8   :  { %v1272_v51 = vadd.f32 %v1271_v44, %v1270_v37 }
 0x1ea   :  { %v1273_v56 = vrot.slane %v1272_v51, 1 }
 0x1ec   :  { %v1274_v61 = vadd.f32 %v1273_v56, %v1272_v51 }
 0x1ee   :  { %v2652_v55 = vmul.f32 %v1274_v61, %v2526_v48 }
 0x1f0   :  { %v1290_v8 = vsub.f32 %v2642_v36, %v2652_v55 }
 0x1f2   :  { %v1293_v16 = vmul.f32 %v1290_v8, %v1290_v8 }
 0x1f3   :  { %v1171_v13 = vpop.f32.mrf.mxu0 }
 0x1f4   :  { %v1172_v38 = vadd.f32 %v1171_v13, %v593_v18  ;;  %v1184_v39 = vpop.f32.mrf.mxu1  ;;  %v1296_v11 = vrot.slane %v1293_v16, 4 }
 0x1f6   :  { %v1185_v43 = vadd.f32 %v1184_v39, %v1172_v38  ;;  %v1297_v25 = vadd.f32 %v1296_v11, %v1293_v16 }
 0x1f8   :  { %v1298_v27 = vrot.slane %v1297_v25, 2 }
 0x1fa   :  { %v1299_v34 = vadd.f32 %v1298_v27, %v1297_v25 }
 0x1fb   :  { %v1197_v45 = vpop.f32.mrf.mxu2  ;;  %v1173_v50 = vpop.f32.mrf.mxu0 }
 0x1fc   :  { %v1198_v46 = vadd.f32 %v1197_v45, %v1185_v43  ;;  %v1210_v47 = vpop.f32.mrf.mxu3  ;;  %v1186_v52 = vpop.f32.mrf.mxu1  ;;  %v1300_v18 = vrot.slane %v1299_v34, 1 }
 0x1fe   :  { %v1211_v49 = vadd.f32 %v1210_v47, %v1198_v46  ;;  %v1301_v39 = vadd.f32 %v1300_v18, %v1299_v34 }
 0x200   :  { %v2647_v53 = vmax.f32 %v1211_v49, 0.0  ;;  %v1314_v46 = vmul.f32 %v1301_v39, %v2526_v48 }
 0x202   :  { %v1275_v54 = vrot.slane %v2647_v53, 4  ;;  %v1317_v50 = vadd.f32 1e-05, %v1314_v46 }
 0x203   :  { %v1199_v57 = vpop.f32.mrf.mxu2 }
 0x204   :  { %v1276_v58 = vadd.f32 %v1275_v54, %v2647_v53  ;;  %v1212_v59 = vpop.f32.mrf.mxu3  ;;  %vm1326_vm9 = vweird.f32 %v1317_v50 }
 0x206   :  { %v1277_v60 = vrot.slane %v1276_v58, 2 }
 0x208   :  { %v1278_v62 = vadd.f32 %v1277_v60, %v1276_v58 }
 0x20a   :  { %v1279_v63 = vrot.slane %v1278_v62, 1 }
 0x20c   :  { %v1280_v10 = vadd.f32 %v1279_v63, %v1278_v62 }
 0x20e   :  { %v2655_v40 = vmul.f32 %v1280_v10, %v2526_v48 }
 0x210   :  { %v1291_v5 = vsub.f32 %v2647_v53, %v2655_v40 }
 0x212   :  { %v1294_v7 = vmul.f32 %v1291_v5, %v1291_v5 }
 0x213   :  { %v1223_v41 = vpop.f32.mrf.mxu0 }
 0x214   :  { %v1224_v42 = vadd.f32 %v1223_v41, %v594_v0  ;;  %v1236_v6 = vpop.f32.mrf.mxu1  ;;  %v1302_v19 = vrot.slane %v1294_v7, 4 }
 0x216   :  { %v1303_v20 = vadd.f32 %v1302_v19, %v1294_v7  ;;  %v1237_v21 = vadd.f32 %v1236_v6, %v1224_v42 }
 0x218   :  { %v1304_v22 = vrot.slane %v1303_v20, 2 }
 0x21a   :  { %v1305_v17 = vadd.f32 %v1304_v22, %v1303_v20 }
 0x21b   :  { %v1249_v23 = vpop.f32.mrf.mxu2  ;;  %v1225_v15 = vpop.f32.mrf.mxu0 }
 0x21c   :  { %v1250_v9 = vadd.f32 %v1249_v23, %v1237_v21  ;;  %v1262_v24 = vpop.f32.mrf.mxu3  ;;  %v1238_v26 = vpop.f32.mrf.mxu1  ;;  %v1306_v29 = vrot.slane %v1305_v17, 1 }
 0x21e   :  { %v1263_v1 = vadd.f32 %v1262_v24, %v1250_v9  ;;  %v1307_v14 = vadd.f32 %v1306_v29, %v1305_v17 }
 0x220   :  { %v2662_v12 = vmax.f32 %v1263_v1, 0.0  ;;  %v1315_v37 = vmul.f32 %v1307_v14, %v2526_v48 }
 0x222   :  { %v1281_v28 = vrot.slane %v2662_v12, 4  ;;  %v1318_v44 = vadd.f32 1e-05, %v1315_v37 }
 0x223   :  { %v1251_v31 = vpop.f32.mrf.mxu2 }
 0x224   :  { %v1282_v32 = vadd.f32 %v1281_v28, %v2662_v12  ;;  %v1264_v33 = vpop.f32.mrf.mxu3  ;;  %2319 = vrsqrt.f32 %v1318_v44  ;;  %vm1336_vm6 = vweird.f32 %v1318_v44 }
 0x225   :  { %2321 = vrsqrt.f32 %v1317_v50 }
 0x226   :  { %v1283_v35 = vrot.slane %v1282_v32, 2 }
 0x228   :  { %v1284_v30 = vadd.f32 %v1283_v35, %v1282_v32 }
 0x22a   :  { %v1285_v13 = vrot.slane %v1284_v30, 1  ;;  %v2320_v54 = vpop.eup %2319 }
 0x22b   :  { %v1331_v57 = vmul.f32 %v2320_v54, %v1318_v44  ;;  %v2322_v60 = vpop.eup %2321  ;;  %vm1337_vm5 = vweird.f32 %v2320_v54 }
 0x22c   :  { %v1286_v38 = vadd.f32 %v1285_v13, %v1284_v30  ;;  %v1321_v63 = vmul.f32 %v2322_v60, %v1317_v50  ;;  %vm1338_vm7 = vmor %vm1336_vm6, %vm1337_vm5  ;;  %vm1327_vm10 = vweird.f32 %v2322_v60 }
 0x22d   :  { %v1332_v61 = vmul.f32 %v2320_v54, %v1331_v57  ;;  %vm1328_vm13 = vmor %vm1326_vm9, %vm1327_vm10 }
 0x22e   :  { %v1289_v43 = vmul.f32 %v1286_v38, %v2526_v48  ;;  %v1322_v0 = vmul.f32 %v2322_v60, %v1321_v63 }
 0x22f   :  { %v1333_v8 = vmul.f32 0.5, %v1332_v61 }
 0x230   :  { %v1292_v45 = vsub.f32 %v2662_v12, %v1289_v43  ;;  %v1323_v41 = vmul.f32 0.5, %v1322_v0 }
 0x231   :  { %v1334_v5 = vsub.f32 1.5, %v1333_v8 }
 0x232   :  { %v1295_v47 = vmul.f32 %v1292_v45, %v1292_v45  ;;  %v1324_v19 = vsub.f32 1.5, %v1323_v41 }
 0x233   :  { %v1335_v42 = vmul.f32 %v2320_v54, %v1334_v5 }
 0x234   :  { %v1308_v49 = vrot.slane %v1295_v47, 4 }
 0x235   :  { %v1339_v21 = vsel %vm1338_vm7, %v2320_v54, %v1335_v42 }
 0x236   :  { %v1309_v51 = vadd.f32 %v1308_v49, %v1295_v47  ;;  %v1353_v23 = vrot.slane %v1339_v21, 7 }
 0x238   :  { %v1310_v52 = vrot.slane %v1309_v51, 2 }
 0x23a   :  { %v1311_v56 = vadd.f32 %v1310_v52, %v1309_v51 }
 0x23c   :  { %v1312_v58 = vrot.slane %v1311_v56, 1 }
 0x23e   :  { %v1313_v59 = vadd.f32 %v1312_v58, %v1311_v56 }
 0x240   :  { %v1316_v62 = vmul.f32 %v1313_v59, %v2526_v48  ;;  %v1325_v48 = vmul.f32 %v2322_v60, %v1324_v19 }
 0x242   :  { %v1319_v10 = vadd.f32 1e-05, %v1316_v62  ;;  %v1329_v24 = vsel %vm1328_vm13, %v2322_v60, %v1325_v48 }
 0x243   :  { %v1355_v25 = vsel %vm220_vm0, %v1329_v24, %v1353_v23 }
 0x244   :  { %2323 = vrsqrt.f32 %v1319_v10  ;;  %vm1346_vm11 = vweird.f32 %v1319_v10 }
 0x24a   :  { %v2324_v7 = vpop.eup %2323 }
 0x24b   :  { %v1341_v16 = vmul.f32 %v2324_v7, %v1319_v10  ;;  %vm1347_vm8 = vweird.f32 %v2324_v7 }
 0x24c   :  { %vm1348_vm12 = vmor %vm1346_vm11, %vm1347_vm8 }
 0x24d   :  { %v1342_v6 = vmul.f32 %v2324_v7, %v1341_v16 }
 0x24f   :  { %v1343_v20 = vmul.f32 0.5, %v1342_v6 }
 0x251   :  { %v1344_v11 = vsub.f32 1.5, %v1343_v20 }
 0x253   :  { %v1345_v22 = vmul.f32 %v2324_v7, %v1344_v11 }
 0x255   :  { %v1349_v9 = vsel %vm1348_vm12, %v2324_v7, %v1345_v22 }
 0x256   :  { %v1354_v15 = vrot.slane %v1349_v9, 6 }
 0x258   :  { %v1356_v26 = vsel %vm409_vm4, %v1355_v25, %v1354_v15 }
 0x259   :  { %v1358_v1 = vmul.f32 %v1356_v26, %v2507_v2 }
 0x25b   :  { %v1360_v17 = vperm.slane %v1358_v1, 0  ;;  %v1361_v27 = vperm.slane %v1358_v1, 1  ;;  %v1362_v28 = vperm.slane %v1358_v1, 2 }
 0x25d   :  { %v1367_v29 = vmul.f32 %v1361_v27, %v2655_v40  ;;  %v1368_v31 = vmul.f32 %v1362_v28, %v1289_v43  ;;  %v1366_v32 = vmul.f32 %v1360_v17, %v2652_v55  ;;  %v1378_v18 = vmul.f32 %v1360_v17, %v2642_v36 }
 0x25e   :  { %v1379_v2 = vmul.f32 %v1361_v27, %v2647_v53  ;;  %v1380_v13 = vmul.f32 %v1362_v28, %v2662_v12 }
 0x25f   :  { %v1372_v33 = vrot.slane %v1367_v29, 7  ;;  %v1373_v34 = vrot.slane %v1368_v31, 6 }
 0x261   :  { %v1374_v35 = vsel %vm220_vm0, %v1366_v32, %v1372_v33 }
 0x262   :  { %v1375_v14 = vsel %vm409_vm4, %v1374_v35, %v1373_v34 }
 0x263   :  { %v1377_v30 = vsub.f32 %v2509_v3, %v1375_v14 }
 0x265   :  { %v1382_v37 = vperm.slane %v1377_v30, 0  ;;  %v1383_v38 = vperm.slane %v1377_v30, 1  ;;  %v1384_v40 = vperm.slane %v1377_v30, 2 }
 0x267   :  { %v1388_v39 = vadd.f32 %v1382_v37, %v1378_v18  ;;  %v1389_v43 = vadd.f32 %v1383_v38, %v1379_v2  ;;  %v1390_v55 = vadd.f32 %v1384_v40, %v1380_v13 }
 0x268   :  { %2453 = dma.done.wait [#allocation4 + $0x1], 3072 }
 0x269   :  { %2454 = vsyncadd [#allocation4 + $0x1], 4294964224  ;;  %v2279_v44 = vld [vmem:[#allocation3 + $0x38] sm:$0xff]  ;;  %v2278_v3 = vld [vmem:[#allocation3 + $0x30] sm:$0xff]  ;;  %v1395_v5 = vpack.c.bf16 %v1388_v39, %v1388_v39  ;;  %v1396_v7 = vpack.c.bf16 %v1389_v43, %v1389_v43  ;;  %v1397_v41 = vpack.c.bf16 %v1390_v55, %v1390_v55 }
 0x26a   :  { %v2287_v45 = vld [vmem:[#allocation3 + $0x78] sm:$0xff]  ;;  %1590 = vmatpush.bf16.msrb.mxu0 %v2279_v44  ;;  %v2286_v47 = vld [vmem:[#allocation3 + $0x70] sm:$0xff]  ;;  %v2277_v53 = vld [vmem:[#allocation3 + $0x28] sm:$0xff] }
 0x26b   :  { %v2295_v46 = vld [vmem:[#allocation3 + $0xb8] sm:$0xff]  ;;  %1603 = vmatpush.bf16.msra.mxu1 %v2287_v45  ;;  %v2294_v36 = vld [vmem:[#allocation3 + $0xb0] sm:$0xff]  ;;  %v2285_v12 = vld [vmem:[#allocation3 + $0x68] sm:$0xff] }
 0x26c   :  { %1616 = vmatpush.bf16.msra.mxu2 %v2295_v46  ;;  %v2293_v49 = vld [vmem:[#allocation3 + $0xa8] sm:$0xff]  ;;  %v2276_v50 = vld [vmem:[#allocation3 + $0x20] sm:$0xff]  ;;  %v2275_v54 = vld [vmem:[#allocation3 + $0x18] sm:$0xff] }
 0x26d   :  { %v2284_v51 = vld [vmem:[#allocation3 + $0x60] sm:$0xff]  ;;  %v2283_v56 = vld [vmem:[#allocation3 + $0x58] sm:$0xff]  ;;  %v2274_v58 = vld [vmem:[#allocation3 + $0x10] sm:$0xff] }
 0x26e   :  { %1591 = vmatpush.bf16.msrb.mxu0 %v2278_v3  ;;  %v2292_v52 = vld [vmem:[#allocation3 + $0xa0] sm:$0xff]  ;;  %v2291_v57 = vld [vmem:[#allocation3 + $0x98] sm:$0xff]  ;;  %v2282_v59 = vld [vmem:[#allocation3 + $0x50] sm:$0xff] }
 0x26f   :  { %1604 = vmatpush.bf16.msra.mxu1 %v2286_v47  ;;  %v2290_v60 = vld [vmem:[#allocation3 + $0x90] sm:$0xff]  ;;  %v2273_v61 = vld [vmem:[#allocation3 + $0x8] sm:$0xff]  ;;  %v2272_v10 = vld [vmem:[#allocation3] sm:$0xff] }
 0x270   :  { %1617 = vmatpush.bf16.msra.mxu2 %v2294_v36  ;;  %v2281_v62 = vld [vmem:[#allocation3 + $0x48] sm:$0xff]  ;;  %v2280_v8 = vld [vmem:[#allocation3 + $0x40] sm:$0xff] }
 0x271   :  { %v2289_v63 = vld [vmem:[#allocation3 + $0x88] sm:$0xff]  ;;  %v2288_v0 = vld [vmem:[#allocation3 + $0x80] sm:$0xff] }
 0x272   :  { %1592 = vmatpush.bf16.msrb.mxu0 %v2277_v53 }
 0x273   :  { %1605 = vmatpush.bf16.msra.mxu1 %v2285_v12 }
 0x274   :  { %1618 = vmatpush.bf16.msra.mxu2 %v2293_v49 }
 0x276   :  { %1593 = vmatpush.bf16.msrb.mxu0 %v2276_v50 }
 0x277   :  { %1606 = vmatpush.bf16.msra.mxu1 %v2284_v51 }
 0x278   :  { %1619 = vmatpush.bf16.msra.mxu2 %v2292_v52 }
 0x27a   :  { %1594 = vmatpush.bf16.msrb.mxu0 %v2275_v54 }
 0x27b   :  { %1607 = vmatpush.bf16.msra.mxu1 %v2283_v56 }
 0x27c   :  { %1620 = vmatpush.bf16.msra.mxu2 %v2291_v57 }
 0x27e   :  { %1595 = vmatpush.bf16.msrb.mxu0 %v2274_v58 }
 0x27f   :  { %1608 = vmatpush.bf16.msra.mxu1 %v2282_v59 }
 0x280   :  { %1621 = vmatpush.bf16.msra.mxu2 %v2290_v60 }
 0x282   :  { %1596 = vmatpush.bf16.msrb.mxu0 %v2273_v61 }
 0x283   :  { %1609 = vmatpush.bf16.msra.mxu1 %v2281_v62 }
 0x284   :  { %1622 = vmatpush.bf16.msra.mxu2 %v2289_v63 }
 0x286   :  { %1597 = vmatpush.bf16.msrb.mxu0 %v2272_v10 }
 0x287   :  { %1610 = vmatpush.bf16.msra.mxu1 %v2280_v8 }
 0x288   :  { %1623 = vmatpush.bf16.msra.mxu2 %v2288_v0 }
 0x289   :  { %1598 = vmatmul.bf16.vlgmr.msrb.gmra.mxu0 %v1395_v5 }
 0x28a   :  { %1611 = vmatmul.bf16.vlgmr.msra.gmra.mxu1 %v1396_v7 }
 0x28b   :  { %1624 = vmatmul.bf16.vlgmr.msra.gmra.mxu2 %v1397_v41 }
 0x306   :  { %v1599_v16 = vpop.f32.mrf.mxu0 }
 0x307   :  { %v1612_v42 = vpop.f32.mrf.mxu1  ;;  %v1600_v6 = vadd.f32 %v1599_v16, %v2511_v4 }
 0x309   :  { %v1613_v19 = vadd.f32 %v1612_v42, %v1600_v6 }
 0x30e   :  { %v1625_v20 = vpop.f32.mrf.mxu2  ;;  %v1601_v11 = vpop.f32.mrf.mxu0 }
 0x30f   :  { %v1626_v21 = vadd.f32 %v1625_v20, %v1613_v19  ;;  %v1614_v48 = vpop.f32.mrf.mxu1 }
 0x311   :  { %2325 = vtanh.f32 %v1626_v21 }
 0x316   :  { %v1627_v22 = vpop.f32.mrf.mxu2 }
 0x317   :  { %v2326_v23 = vpop.eup %2325 }
 0x318   :  { %1630 = vst [vmem:[%s2691_s5] sm:$0xff] %v2326_v23 }
 0x319   :  { %1635 = vsyncpa [#allocation6], 1 }
 0x31a   :  { %1636 = vsyncpa [#allocation8], 1 }
 0x31b   :  { %1637 = vsyncmov [#allocation4] }
 0x31e   :  { %s1638_s19 = vpop.sfrf %1637 }
 0x31f   :  { %p2166_p0 = scmp.ne.s32.totalorder %s1638_s19, 0 }
 0x321   :  { %1642 = shalt.err (%p2166_p0)  }
 0x322   :  { %1644 = vsyncmov [#allocation4 + $0x1] }
 0x325   :  { %s1645_s20 = vpop.sfrf %1644 }
 0x326   :  { %p2167_p1 = scmp.ne.s32.totalorder %s1645_s20, 0 }
 0x328   :  { %1649 = shalt.err (%p2167_p1)  }

</bundles_post_ra>
